<compile_context>
chip_gen: v7x
topology: tpu7x:2x2x1
jax: 0.10.0
libtpu: 0.0.40
codegen_flags: <defaults>
</compile_context>

<pallas_src>
import functools

import jax
import jax.numpy as jnp
from jax import lax
from jax.experimental import pallas as pl
from jax.experimental.pallas import tpu as pltpu


def make_deeplog_kernel(num_layers, seq_len, tb, input_size, hidden, nk_pad):
    """One batch tile: multi-layer LSTM (zero init h/c) over the whole sequence with a
    wavefront schedule, then Linear(hidden, nk_pad) on the top layer's last hidden state."""
    H = hidden
    G = 4 * hidden

    def kernel(x_ref, *refs):
        out_ref = refs[-1]
        wfc_ref, bfc_ref = refs[-3], refs[-2]
        wih0_ref, whh0_ref, b0_ref = refs[0], refs[1], refs[2]
        fused_refs = refs[3:3 + 2 * (num_layers - 1)]  # [wf_1, b_1, wf_2, b_2, ...]

        # Lane mask for the g-gate block (tanh); i/f/o lanes get sigmoid via
        # 0.5*tanh(0.5*x)+0.5 so each cell step costs a single full-width EUP tanh.
        lane = lax.broadcasted_iota(jnp.int32, (tb, G), 1)
        g_mask = (lane >= 2 * H) & (lane < 3 * H)
        act_scale = jnp.where(g_mask, 1.0, 0.5).astype(jnp.float32)

        # Hoisted (loop-invariant) weight loads.
        wih0 = wih0_ref[...]                                               # (in, 4H) f32
        whh0 = whh0_ref[...]                                               # (H, 4H) bf16
        b0 = b0_ref[...]                                                   # (1, 4H) f32
        wf = [fused_refs[2 * i][...] for i in range(num_layers - 1)]       # (2H,4H) bf16
        bf_ = [fused_refs[2 * i + 1][...] for i in range(num_layers - 1)]  # (1, 4H) f32

        # Layer-0 input projection for every timestep (independent of the recurrence,
        # so it never sits on the serial h->c->h chain).
        if input_size == 1:
            # Degenerate K=1 matmul -> VPU broadcast multiply.
            xp0 = [x_ref[t] * wih0 + b0 for t in range(seq_len)]
        else:
            x2d = x_ref[...].reshape(seq_len * tb, input_size)
            xall = jnp.dot(x2d.astype(jnp.bfloat16), wih0.astype(jnp.bfloat16),
                           preferred_element_type=jnp.float32) + b0
            xp0 = [xall[t * tb:(t + 1) * tb, :] for t in range(seq_len)]

        h = [jnp.zeros((tb, H), jnp.float32) for _ in range(num_layers)]
        c = [jnp.zeros((tb, H), jnp.float32) for _ in range(num_layers)]

        def cell_step(z, c_prev):
            # One EUP push: tanh over the whole (tb, 4H) vreg; recover sigmoid lanes.
            tz = jnp.tanh(z * act_scale)
            a = jnp.where(g_mask, tz, 0.5 * tz + 0.5)  # [sig(i)|sig(f)|tanh(g)|sig(o)]
            i_g = a[:, 0 * H:1 * H]
            f_g = a[:, 1 * H:2 * H]
            g_g = a[:, 2 * H:3 * H]
            o_g = a[:, 3 * H:4 * H]
            c_new = f_g * c_prev + i_g * g_g
            h_new = o_g * jnp.tanh(c_new)
            return h_new, c_new

        # Wavefront schedule: at step w, layer l handles timestep t = w - l.  The cell
        # updates emitted within one wavefront step are data-independent, so their MXU/EUP
        # chains overlap.  Layers are emitted top-down so each layer reads the below
        # layer's h from the previous wavefront step (i.e. the same timestep t).
        for w in range(seq_len + num_layers - 1):
            for l in reversed(range(num_layers)):
                t = w - l
                if t < 0 or t >= seq_len:
                    continue
                if l == 0:
                    z = xp0[t] + jnp.dot(h[0].astype(jnp.bfloat16), whh0,
                                         preferred_element_type=jnp.float32)
                else:
                    # Fused [W_ih ; W_hh]: one K=2H MXU push on [h_below_t ; h_this_{t-1}].
                    inp = jnp.concatenate([h[l - 1], h[l]], axis=1).astype(jnp.bfloat16)
                    z = jnp.dot(inp, wf[l - 1],
                                preferred_element_type=jnp.float32) + bf_[l - 1]
                h[l], c[l] = cell_step(z, c[l])

        # fc on the top layer's last hidden state; lane-dense (nk_pad) store.
        out_ref[...] = (jnp.dot(h[num_layers - 1].astype(jnp.bfloat16), wfc_ref[...],
                                preferred_element_type=jnp.float32) + bfc_ref[...])

    return kernel


def _full_block_spec(arr):
    nd = arr.ndim
    return pl.BlockSpec(arr.shape, lambda i, _nd=nd: (0,) * _nd)


@functools.partial(
    jax.jit, static_argnames=("num_layers", "hidden", "num_keys", "input_size"))
def deeplog_forward(x, flat_params, *, num_layers, hidden, num_keys, input_size):
    """x: (batch, seq, input_size) float32 (PyTorch batch_first convention)."""
    batch, seq_len, _ = x.shape
    TB = 8                                       # batch tile (f32 sublane aligned)
    b_pad = ((batch + TB - 1) // TB) * TB
    nk_pad = ((num_keys + 127) // 128) * 128     # lane-dense output store

    # Time-major layout so each timestep is a clean (TB, input_size) sublane slice.
    x_tm = jnp.transpose(x, (1, 0, 2))           # (seq, batch, input_size)
    if b_pad != batch:
        x_tm = jnp.pad(x_tm, ((0, 0), (0, b_pad - batch), (0, 0)))

    params = list(flat_params)
    # Layer 0: W_ih/bias stay f32 (VPU path); recurrent weight in bf16 for the MXU.
    prepped = [params[0], params[1].astype(jnp.bfloat16), params[2]]
    # Layers >= 1: fuse W_ih and W_hh into a single (2H, 4H) bf16 weight.
    for l in range(1, num_layers):
        wih_l, whh_l, b_l = params[3 * l:3 * l + 3]
        prepped.append(jnp.concatenate([wih_l, whh_l], axis=0).astype(jnp.bfloat16))
        prepped.append(b_l)
    # Final fc: pad num_keys to a full 128-lane store; weight in bf16.
    w_fc = params[3 * num_layers]
    b_fc = params[3 * num_layers + 1]
    if nk_pad != num_keys:
        w_fc = jnp.pad(w_fc, ((0, 0), (0, nk_pad - num_keys)))
        b_fc = jnp.pad(b_fc, ((0, 0), (0, nk_pad - num_keys)))
    prepped += [w_fc.astype(jnp.bfloat16), b_fc]

    kernel = make_deeplog_kernel(num_layers, seq_len, TB, input_size, hidden, nk_pad)

    in_specs = [pl.BlockSpec((seq_len, TB, input_size), lambda i: (0, i, 0))]
    in_specs += [_full_block_spec(p) for p in prepped]

    out_pad = pl.pallas_call(
        kernel,
        out_shape=jax.ShapeDtypeStruct((b_pad, nk_pad), jnp.float32),
        grid=(b_pad // TB,),
        in_specs=in_specs,
        out_specs=pl.BlockSpec((TB, nk_pad), lambda i: (i, 0)),
        compiler_params=pltpu.CompilerParams(dimension_semantics=("parallel",)),
    )(x_tm, *prepped)
    return out_pad[:batch, :num_keys]


def init_params(key, input_size, hidden, num_layers, num_keys):
    """Deterministic PyTorch-style init: U(-1/sqrt(hidden), 1/sqrt(hidden))."""
    bound = 1.0 / jnp.sqrt(jnp.float32(hidden))
    flat = []
    for l in range(num_layers):
        in_l = input_size if l == 0 else hidden
        key, k1, k2, k3, k4 = jax.random.split(key, 5)
        w_ih = jax.random.uniform(k1, (4 * hidden, in_l), jnp.float32, -bound, bound)
        w_hh = jax.random.uniform(k2, (4 * hidden, hidden), jnp.float32, -bound, bound)
        b_ih = jax.random.uniform(k3, (4 * hidden,), jnp.float32, -bound, bound)
        b_hh = jax.random.uniform(k4, (4 * hidden,), jnp.float32, -bound, bound)
        # Pre-transpose so kernel does x @ W; combine the two PyTorch biases.
        flat += [w_ih.T, w_hh.T, (b_ih + b_hh).reshape(1, 4 * hidden)]
    key, k5, k6 = jax.random.split(key, 3)
    fc_bound = 1.0 / jnp.sqrt(jnp.float32(hidden))
    w_fc = jax.random.uniform(k5, (num_keys, hidden), jnp.float32, -fc_bound, fc_bound)
    b_fc = jax.random.uniform(k6, (num_keys,), jnp.float32, -fc_bound, fc_bound)
    flat += [w_fc.T, b_fc.reshape(1, num_keys)]
    return flat


def reference_forward(x, flat_params, num_layers, hidden, num_keys):
    """Pure-JAX f32 reference with identical semantics (for correctness check)."""
    batch, seq_len, _ = x.shape
    layer_params = [flat_params[3 * l: 3 * l + 3] for l in range(num_layers)]
    w_fc, b_fc = flat_params[3 * num_layers], flat_params[3 * num_layers + 1]
    h = [jnp.zeros((batch, hidden), jnp.float32) for _ in range(num_layers)]
    c = [jnp.zeros((batch, hidden), jnp.float32) for _ in range(num_layers)]
    for t in range(seq_len):
        inp = x[:, t, :]
        for l in range(num_layers):
            wih, whh, b = layer_params[l]
            gates = inp @ wih + h[l] @ whh + b
            i_g = jax.nn.sigmoid(gates[:, 0 * hidden:1 * hidden])
            f_g = jax.nn.sigmoid(gates[:, 1 * hidden:2 * hidden])
            g_g = jnp.tanh(gates[:, 2 * hidden:3 * hidden])
            o_g = jax.nn.sigmoid(gates[:, 3 * hidden:4 * hidden])
            c[l] = f_g * c[l] + i_g * g_g
            h[l] = o_g * jnp.tanh(c[l])
            inp = h[l]
    return h[-1] @ w_fc + b_fc


if __name__ == "__main__":
    # Small DeepLog-like config: window of 8 log keys, scalar inputs.
    batch, seq_len = 2, 8
    input_size, hidden_size, num_layers, num_keys = 1, 32, 2, 16

    key = jax.random.PRNGKey(0)
    key, kx = jax.random.split(key)
    x = jax.random.normal(kx, (batch, seq_len, input_size), jnp.float32)

    flat_params = init_params(key, input_size, hidden_size, num_layers, num_keys)

    out = deeplog_forward(
        x, tuple(flat_params),
        num_layers=num_layers, hidden=hidden_size, num_keys=num_keys,
        input_size=input_size,
    )
    out = jax.block_until_ready(out)

    ref = reference_forward(x, flat_params, num_layers, hidden_size, num_keys)
    assert out.shape == (batch, num_keys)
    # Tolerance accounts for bf16 MXU operands in the recurrent/fc matmuls.
    assert jnp.allclose(out, ref, atol=2e-2, rtol=2e-2)

    print("KERNEL_OK")
</pallas_src>

<mosaic_0001>
module attributes {stable_mosaic.version = 11 : i64} {
  func.func @kernel(%arg0: i32, %arg1: memref<8x8x1xf32, #tpu.memory_space<vmem>>, %arg2: memref<1x128xf32, #tpu.memory_space<vmem>>, %arg3: memref<32x128xbf16, #tpu.memory_space<vmem>>, %arg4: memref<1x128xf32, #tpu.memory_space<vmem>>, %arg5: memref<64x128xbf16, #tpu.memory_space<vmem>>, %arg6: memref<1x128xf32, #tpu.memory_space<vmem>>, %arg7: memref<32x128xbf16, #tpu.memory_space<vmem>>, %arg8: memref<1x128xf32, #tpu.memory_space<vmem>>, %arg9: memref<8x128xf32, #tpu.memory_space<vmem>>) attributes {dimension_semantics = [#tpu.dimension_semantics<parallel>], iteration_bounds = array<i64: 1>, scalar_prefetch = 0 : i64, scratch_operands = 0 : i64, tpu.core_type = #tpu.core_type<tc>, window_params = [{transform_indices = @transform_0, window_bounds = array<i64: 8, 8, 1>}, {pipeline_mode = #tpu.pipeline_mode<synchronous>, transform_indices = @transform_1, window_bounds = array<i64: 1, 128>}, {pipeline_mode = #tpu.pipeline_mode<synchronous>, transform_indices = @transform_2, window_bounds = array<i64: 32, 128>}, {pipeline_mode = #tpu.pipeline_mode<synchronous>, transform_indices = @transform_3, window_bounds = array<i64: 1, 128>}, {pipeline_mode = #tpu.pipeline_mode<synchronous>, transform_indices = @transform_4, window_bounds = array<i64: 64, 128>}, {pipeline_mode = #tpu.pipeline_mode<synchronous>, transform_indices = @transform_5, window_bounds = array<i64: 1, 128>}, {pipeline_mode = #tpu.pipeline_mode<synchronous>, transform_indices = @transform_6, window_bounds = array<i64: 32, 128>}, {pipeline_mode = #tpu.pipeline_mode<synchronous>, transform_indices = @transform_7, window_bounds = array<i64: 1, 128>}, {transform_indices = @transform_8, window_bounds = array<i64: 8, 128>}]} {
    %0 = tpu.iota {dimensions = array<i32: 1>} : vector<8x128xi32>
    %c64_i32 = arith.constant 64 : i32
    %1 = vector.broadcast %c64_i32 : i32 to vector<8x128xi32>
    %2 = arith.cmpi sge, %0, %1 : vector<8x128xi32>
    %c96_i32 = arith.constant 96 : i32
    %3 = vector.broadcast %c96_i32 : i32 to vector<8x128xi32>
    %4 = arith.cmpi slt, %0, %3 : vector<8x128xi32>
    %5 = arith.andi %2, %4 : vector<8x128xi1>
    %cst = arith.constant 1.000000e+00 : f32
    %cst_0 = arith.constant 5.000000e-01 : f32
    %6 = vector.broadcast %cst : f32 to vector<8x128xf32>
    %7 = vector.broadcast %cst_0 : f32 to vector<8x128xf32>
    %8 = arith.select %5, %6, %7 : vector<8x128xi1>, vector<8x128xf32>
    %c0 = arith.constant 0 : index
    %c0_1 = arith.constant 0 : index
    %9 = vector.load %arg2[%c0, %c0_1] : memref<1x128xf32, #tpu.memory_space<vmem>>, vector<1x128xf32>
    %c0_2 = arith.constant 0 : index
    %c0_3 = arith.constant 0 : index
    %10 = vector.load %arg3[%c0_2, %c0_3] : memref<32x128xbf16, #tpu.memory_space<vmem>>, vector<32x128xbf16>
    %c0_4 = arith.constant 0 : index
    %c0_5 = arith.constant 0 : index
    %11 = vector.load %arg4[%c0_4, %c0_5] : memref<1x128xf32, #tpu.memory_space<vmem>>, vector<1x128xf32>
    %c0_6 = arith.constant 0 : index
    %c0_7 = arith.constant 0 : index
    %12 = vector.load %arg5[%c0_6, %c0_7] : memref<64x128xbf16, #tpu.memory_space<vmem>>, vector<64x128xbf16>
    %c0_8 = arith.constant 0 : index
    %c0_9 = arith.constant 0 : index
    %13 = vector.load %arg6[%c0_8, %c0_9] : memref<1x128xf32, #tpu.memory_space<vmem>>, vector<1x128xf32>
    %c0_10 = arith.constant 0 : index
    %c0_11 = arith.constant 0 : index
    %c0_12 = arith.constant 0 : index
    %14 = vector.load %arg1[%c0_10, %c0_11, %c0_12] : memref<8x8x1xf32, #tpu.memory_space<vmem>>, vector<1x8x1xf32>
    %15 = vector.shape_cast %14 : vector<1x8x1xf32> to vector<8x1xf32>
    %16 = vector.broadcast %15 : vector<8x1xf32> to vector<8x128xf32>
    %17 = vector.broadcast %9 : vector<1x128xf32> to vector<8x128xf32>
    %18 = arith.mulf %16, %17 : vector<8x128xf32>
    %19 = vector.broadcast %11 : vector<1x128xf32> to vector<8x128xf32>
    %20 = arith.addf %18, %19 : vector<8x128xf32>
    %c1 = arith.constant 1 : index
    %c0_13 = arith.constant 0 : index
    %c0_14 = arith.constant 0 : index
    %21 = vector.load %arg1[%c1, %c0_13, %c0_14] : memref<8x8x1xf32, #tpu.memory_space<vmem>>, vector<1x8x1xf32>
    %22 = vector.shape_cast %21 : vector<1x8x1xf32> to vector<8x1xf32>
    %23 = vector.broadcast %22 : vector<8x1xf32> to vector<8x128xf32>
    %24 = vector.broadcast %9 : vector<1x128xf32> to vector<8x128xf32>
    %25 = arith.mulf %23, %24 : vector<8x128xf32>
    %26 = vector.broadcast %11 : vector<1x128xf32> to vector<8x128xf32>
    %27 = arith.addf %25, %26 : vector<8x128xf32>
    %c2 = arith.constant 2 : index
    %c0_15 = arith.constant 0 : index
    %c0_16 = arith.constant 0 : index
    %28 = vector.load %arg1[%c2, %c0_15, %c0_16] : memref<8x8x1xf32, #tpu.memory_space<vmem>>, vector<1x8x1xf32>
    %29 = vector.shape_cast %28 : vector<1x8x1xf32> to vector<8x1xf32>
    %30 = vector.broadcast %29 : vector<8x1xf32> to vector<8x128xf32>
    %31 = vector.broadcast %9 : vector<1x128xf32> to vector<8x128xf32>
    %32 = arith.mulf %30, %31 : vector<8x128xf32>
    %33 = vector.broadcast %11 : vector<1x128xf32> to vector<8x128xf32>
    %34 = arith.addf %32, %33 : vector<8x128xf32>
    %c3 = arith.constant 3 : index
    %c0_17 = arith.constant 0 : index
    %c0_18 = arith.constant 0 : index
    %35 = vector.load %arg1[%c3, %c0_17, %c0_18] : memref<8x8x1xf32, #tpu.memory_space<vmem>>, vector<1x8x1xf32>
    %36 = vector.shape_cast %35 : vector<1x8x1xf32> to vector<8x1xf32>
    %37 = vector.broadcast %36 : vector<8x1xf32> to vector<8x128xf32>
    %38 = vector.broadcast %9 : vector<1x128xf32> to vector<8x128xf32>
    %39 = arith.mulf %37, %38 : vector<8x128xf32>
    %40 = vector.broadcast %11 : vector<1x128xf32> to vector<8x128xf32>
    %41 = arith.addf %39, %40 : vector<8x128xf32>
    %c4 = arith.constant 4 : index
    %c0_19 = arith.constant 0 : index
    %c0_20 = arith.constant 0 : index
    %42 = vector.load %arg1[%c4, %c0_19, %c0_20] : memref<8x8x1xf32, #tpu.memory_space<vmem>>, vector<1x8x1xf32>
    %43 = vector.shape_cast %42 : vector<1x8x1xf32> to vector<8x1xf32>
    %44 = vector.broadcast %43 : vector<8x1xf32> to vector<8x128xf32>
    %45 = vector.broadcast %9 : vector<1x128xf32> to vector<8x128xf32>
    %46 = arith.mulf %44, %45 : vector<8x128xf32>
    %47 = vector.broadcast %11 : vector<1x128xf32> to vector<8x128xf32>
    %48 = arith.addf %46, %47 : vector<8x128xf32>
    %c5 = arith.constant 5 : index
    %c0_21 = arith.constant 0 : index
    %c0_22 = arith.constant 0 : index
    %49 = vector.load %arg1[%c5, %c0_21, %c0_22] : memref<8x8x1xf32, #tpu.memory_space<vmem>>, vector<1x8x1xf32>
    %50 = vector.shape_cast %49 : vector<1x8x1xf32> to vector<8x1xf32>
    %51 = vector.broadcast %50 : vector<8x1xf32> to vector<8x128xf32>
    %52 = vector.broadcast %9 : vector<1x128xf32> to vector<8x128xf32>
    %53 = arith.mulf %51, %52 : vector<8x128xf32>
    %54 = vector.broadcast %11 : vector<1x128xf32> to vector<8x128xf32>
    %55 = arith.addf %53, %54 : vector<8x128xf32>
    %c6 = arith.constant 6 : index
    %c0_23 = arith.constant 0 : index
    %c0_24 = arith.constant 0 : index
    %56 = vector.load %arg1[%c6, %c0_23, %c0_24] : memref<8x8x1xf32, #tpu.memory_space<vmem>>, vector<1x8x1xf32>
    %57 = vector.shape_cast %56 : vector<1x8x1xf32> to vector<8x1xf32>
    %58 = vector.broadcast %57 : vector<8x1xf32> to vector<8x128xf32>
    %59 = vector.broadcast %9 : vector<1x128xf32> to vector<8x128xf32>
    %60 = arith.mulf %58, %59 : vector<8x128xf32>
    %61 = vector.broadcast %11 : vector<1x128xf32> to vector<8x128xf32>
    %62 = arith.addf %60, %61 : vector<8x128xf32>
    %c7 = arith.constant 7 : index
    %c0_25 = arith.constant 0 : index
    %c0_26 = arith.constant 0 : index
    %63 = vector.load %arg1[%c7, %c0_25, %c0_26] : memref<8x8x1xf32, #tpu.memory_space<vmem>>, vector<1x8x1xf32>
    %64 = vector.shape_cast %63 : vector<1x8x1xf32> to vector<8x1xf32>
    %65 = vector.broadcast %64 : vector<8x1xf32> to vector<8x128xf32>
    %66 = vector.broadcast %9 : vector<1x128xf32> to vector<8x128xf32>
    %67 = arith.mulf %65, %66 : vector<8x128xf32>
    %68 = vector.broadcast %11 : vector<1x128xf32> to vector<8x128xf32>
    %69 = arith.addf %67, %68 : vector<8x128xf32>
    %cst_27 = arith.constant 0.000000e+00 : f32
    %70 = vector.broadcast %cst_27 : f32 to vector<8x32xf32>
    %cst_28 = arith.constant 0.000000e+00 : f32
    %71 = vector.broadcast %cst_28 : f32 to vector<8x32xf32>
    %cst_29 = arith.constant 0.000000e+00 : f32
    %72 = vector.broadcast %cst_29 : f32 to vector<8x32xf32>
    %cst_30 = arith.constant 0.000000e+00 : f32
    %73 = vector.broadcast %cst_30 : f32 to vector<8x32xf32>
    %74 = arith.truncf %70 : vector<8x32xf32> to vector<8x32xbf16>
    %cst_31 = arith.constant dense<0.000000e+00> : vector<8x128xf32>
    %75 = tpu.matmul %74, %10, %cst_31 {dimension_numbers = #tpu.dot_dimension_numbers<[1], [0], [0], [1], [0, 0, 1, 1], [], []>} : vector<8x32xbf16>, vector<32x128xbf16>, vector<8x128xf32> -> vector<8x128xf32>
    %76 = arith.addf %20, %75 : vector<8x128xf32>
    %77 = arith.mulf %76, %8 : vector<8x128xf32>
    %78 = math.tanh %77 : vector<8x128xf32>
    %cst_32 = arith.constant 5.000000e-01 : f32
    %79 = vector.broadcast %cst_32 : f32 to vector<8x128xf32>
    %80 = arith.mulf %79, %78 : vector<8x128xf32>
    %cst_33 = arith.constant 5.000000e-01 : f32
    %81 = vector.broadcast %cst_33 : f32 to vector<8x128xf32>
    %82 = arith.addf %80, %81 : vector<8x128xf32>
    %83 = arith.select %5, %78, %82 : vector<8x128xi1>, vector<8x128xf32>
    %84 = vector.extract_strided_slice %83 {offsets = [0, 0], sizes = [8, 32], strides = [1, 1]} : vector<8x128xf32> to vector<8x32xf32>
    %85 = vector.extract_strided_slice %83 {offsets = [0, 32], sizes = [8, 32], strides = [1, 1]} : vector<8x128xf32> to vector<8x32xf32>
    %86 = vector.extract_strided_slice %83 {offsets = [0, 64], sizes = [8, 32], strides = [1, 1]} : vector<8x128xf32> to vector<8x32xf32>
    %87 = vector.extract_strided_slice %83 {offsets = [0, 96], sizes = [8, 32], strides = [1, 1]} : vector<8x128xf32> to vector<8x32xf32>
    %88 = arith.mulf %85, %72 : vector<8x32xf32>
    %89 = arith.mulf %84, %86 : vector<8x32xf32>
    %90 = arith.addf %88, %89 : vector<8x32xf32>
    %91 = math.tanh %90 : vector<8x32xf32>
    %92 = arith.mulf %87, %91 : vector<8x32xf32>
    %93 = tpu.concatenate %92, %71 in 1 : vector<8x32xf32>, vector<8x32xf32> -> vector<8x64xf32>
    %94 = arith.truncf %93 : vector<8x64xf32> to vector<8x64xbf16>
    %cst_34 = arith.constant dense<0.000000e+00> : vector<8x128xf32>
    %95 = tpu.matmul %94, %12, %cst_34 {dimension_numbers = #tpu.dot_dimension_numbers<[1], [0], [0], [1], [0, 0, 1, 1], [], []>} : vector<8x64xbf16>, vector<64x128xbf16>, vector<8x128xf32> -> vector<8x128xf32>
    %96 = vector.broadcast %13 : vector<1x128xf32> to vector<8x128xf32>
    %97 = arith.addf %95, %96 : vector<8x128xf32>
    %98 = arith.mulf %97, %8 : vector<8x128xf32>
    %99 = math.tanh %98 : vector<8x128xf32>
    %cst_35 = arith.constant 5.000000e-01 : f32
    %100 = vector.broadcast %cst_35 : f32 to vector<8x128xf32>
    %101 = arith.mulf %100, %99 : vector<8x128xf32>
    %cst_36 = arith.constant 5.000000e-01 : f32
    %102 = vector.broadcast %cst_36 : f32 to vector<8x128xf32>
    %103 = arith.addf %101, %102 : vector<8x128xf32>
    %104 = arith.select %5, %99, %103 : vector<8x128xi1>, vector<8x128xf32>
    %105 = vector.extract_strided_slice %104 {offsets = [0, 0], sizes = [8, 32], strides = [1, 1]} : vector<8x128xf32> to vector<8x32xf32>
    %106 = vector.extract_strided_slice %104 {offsets = [0, 32], sizes = [8, 32], strides = [1, 1]} : vector<8x128xf32> to vector<8x32xf32>
    %107 = vector.extract_strided_slice %104 {offsets = [0, 64], sizes = [8, 32], strides = [1, 1]} : vector<8x128xf32> to vector<8x32xf32>
    %108 = vector.extract_strided_slice %104 {offsets = [0, 96], sizes = [8, 32], strides = [1, 1]} : vector<8x128xf32> to vector<8x32xf32>
    %109 = arith.mulf %106, %73 : vector<8x32xf32>
    %110 = arith.mulf %105, %107 : vector<8x32xf32>
    %111 = arith.addf %109, %110 : vector<8x32xf32>
    %112 = math.tanh %111 : vector<8x32xf32>
    %113 = arith.mulf %108, %112 : vector<8x32xf32>
    %114 = arith.truncf %92 : vector<8x32xf32> to vector<8x32xbf16>
    %cst_37 = arith.constant dense<0.000000e+00> : vector<8x128xf32>
    %115 = tpu.matmul %114, %10, %cst_37 {dimension_numbers = #tpu.dot_dimension_numbers<[1], [0], [0], [1], [0, 0, 1, 1], [], []>} : vector<8x32xbf16>, vector<32x128xbf16>, vector<8x128xf32> -> vector<8x128xf32>
    %116 = arith.addf %27, %115 : vector<8x128xf32>
    %117 = arith.mulf %116, %8 : vector<8x128xf32>
    %118 = math.tanh %117 : vector<8x128xf32>
    %cst_38 = arith.constant 5.000000e-01 : f32
    %119 = vector.broadcast %cst_38 : f32 to vector<8x128xf32>
    %120 = arith.mulf %119, %118 : vector<8x128xf32>
    %cst_39 = arith.constant 5.000000e-01 : f32
    %121 = vector.broadcast %cst_39 : f32 to vector<8x128xf32>
    %122 = arith.addf %120, %121 : vector<8x128xf32>
    %123 = arith.select %5, %118, %122 : vector<8x128xi1>, vector<8x128xf32>
    %124 = vector.extract_strided_slice %123 {offsets = [0, 0], sizes = [8, 32], strides = [1, 1]} : vector<8x128xf32> to vector<8x32xf32>
    %125 = vector.extract_strided_slice %123 {offsets = [0, 32], sizes = [8, 32], strides = [1, 1]} : vector<8x128xf32> to vector<8x32xf32>
    %126 = vector.extract_strided_slice %123 {offsets = [0, 64], sizes = [8, 32], strides = [1, 1]} : vector<8x128xf32> to vector<8x32xf32>
    %127 = vector.extract_strided_slice %123 {offsets = [0, 96], sizes = [8, 32], strides = [1, 1]} : vector<8x128xf32> to vector<8x32xf32>
    %128 = arith.mulf %125, %90 : vector<8x32xf32>
    %129 = arith.mulf %124, %126 : vector<8x32xf32>
    %130 = arith.addf %128, %129 : vector<8x32xf32>
    %131 = math.tanh %130 : vector<8x32xf32>
    %132 = arith.mulf %127, %131 : vector<8x32xf32>
    %133 = tpu.concatenate %132, %113 in 1 : vector<8x32xf32>, vector<8x32xf32> -> vector<8x64xf32>
    %134 = arith.truncf %133 : vector<8x64xf32> to vector<8x64xbf16>
    %cst_40 = arith.constant dense<0.000000e+00> : vector<8x128xf32>
    %135 = tpu.matmul %134, %12, %cst_40 {dimension_numbers = #tpu.dot_dimension_numbers<[1], [0], [0], [1], [0, 0, 1, 1], [], []>} : vector<8x64xbf16>, vector<64x128xbf16>, vector<8x128xf32> -> vector<8x128xf32>
    %136 = vector.broadcast %13 : vector<1x128xf32> to vector<8x128xf32>
    %137 = arith.addf %135, %136 : vector<8x128xf32>
    %138 = arith.mulf %137, %8 : vector<8x128xf32>
    %139 = math.tanh %138 : vector<8x128xf32>
    %cst_41 = arith.constant 5.000000e-01 : f32
    %140 = vector.broadcast %cst_41 : f32 to vector<8x128xf32>
    %141 = arith.mulf %140, %139 : vector<8x128xf32>
    %cst_42 = arith.constant 5.000000e-01 : f32
    %142 = vector.broadcast %cst_42 : f32 to vector<8x128xf32>
    %143 = arith.addf %141, %142 : vector<8x128xf32>
    %144 = arith.select %5, %139, %143 : vector<8x128xi1>, vector<8x128xf32>
    %145 = vector.extract_strided_slice %144 {offsets = [0, 0], sizes = [8, 32], strides = [1, 1]} : vector<8x128xf32> to vector<8x32xf32>
    %146 = vector.extract_strided_slice %144 {offsets = [0, 32], sizes = [8, 32], strides = [1, 1]} : vector<8x128xf32> to vector<8x32xf32>
    %147 = vector.extract_strided_slice %144 {offsets = [0, 64], sizes = [8, 32], strides = [1, 1]} : vector<8x128xf32> to vector<8x32xf32>
    %148 = vector.extract_strided_slice %144 {offsets = [0, 96], sizes = [8, 32], strides = [1, 1]} : vector<8x128xf32> to vector<8x32xf32>
    %149 = arith.mulf %146, %111 : vector<8x32xf32>
    %150 = arith.mulf %145, %147 : vector<8x32xf32>
    %151 = arith.addf %149, %150 : vector<8x32xf32>
    %152 = math.tanh %151 : vector<8x32xf32>
    %153 = arith.mulf %148, %152 : vector<8x32xf32>
    %154 = arith.truncf %132 : vector<8x32xf32> to vector<8x32xbf16>
    %cst_43 = arith.constant dense<0.000000e+00> : vector<8x128xf32>
    %155 = tpu.matmul %154, %10, %cst_43 {dimension_numbers = #tpu.dot_dimension_numbers<[1], [0], [0], [1], [0, 0, 1, 1], [], []>} : vector<8x32xbf16>, vector<32x128xbf16>, vector<8x128xf32> -> vector<8x128xf32>
    %156 = arith.addf %34, %155 : vector<8x128xf32>
    %157 = arith.mulf %156, %8 : vector<8x128xf32>
    %158 = math.tanh %157 : vector<8x128xf32>
    %cst_44 = arith.constant 5.000000e-01 : f32
    %159 = vector.broadcast %cst_44 : f32 to vector<8x128xf32>
    %160 = arith.mulf %159, %158 : vector<8x128xf32>
    %cst_45 = arith.constant 5.000000e-01 : f32
    %161 = vector.broadcast %cst_45 : f32 to vector<8x128xf32>
    %162 = arith.addf %160, %161 : vector<8x128xf32>
    %163 = arith.select %5, %158, %162 : vector<8x128xi1>, vector<8x128xf32>
    %164 = vector.extract_strided_slice %163 {offsets = [0, 0], sizes = [8, 32], strides = [1, 1]} : vector<8x128xf32> to vector<8x32xf32>
    %165 = vector.extract_strided_slice %163 {offsets = [0, 32], sizes = [8, 32], strides = [1, 1]} : vector<8x128xf32> to vector<8x32xf32>
    %166 = vector.extract_strided_slice %163 {offsets = [0, 64], sizes = [8, 32], strides = [1, 1]} : vector<8x128xf32> to vector<8x32xf32>
    %167 = vector.extract_strided_slice %163 {offsets = [0, 96], sizes = [8, 32], strides = [1, 1]} : vector<8x128xf32> to vector<8x32xf32>
    %168 = arith.mulf %165, %130 : vector<8x32xf32>
    %169 = arith.mulf %164, %166 : vector<8x32xf32>
    %170 = arith.addf %168, %169 : vector<8x32xf32>
    %171 = math.tanh %170 : vector<8x32xf32>
    %172 = arith.mulf %167, %171 : vector<8x32xf32>
    %173 = tpu.concatenate %172, %153 in 1 : vector<8x32xf32>, vector<8x32xf32> -> vector<8x64xf32>
    %174 = arith.truncf %173 : vector<8x64xf32> to vector<8x64xbf16>
    %cst_46 = arith.constant dense<0.000000e+00> : vector<8x128xf32>
    %175 = tpu.matmul %174, %12, %cst_46 {dimension_numbers = #tpu.dot_dimension_numbers<[1], [0], [0], [1], [0, 0, 1, 1], [], []>} : vector<8x64xbf16>, vector<64x128xbf16>, vector<8x128xf32> -> vector<8x128xf32>
    %176 = vector.broadcast %13 : vector<1x128xf32> to vector<8x128xf32>
    %177 = arith.addf %175, %176 : vector<8x128xf32>
    %178 = arith.mulf %177, %8 : vector<8x128xf32>
    %179 = math.tanh %178 : vector<8x128xf32>
    %cst_47 = arith.constant 5.000000e-01 : f32
    %180 = vector.broadcast %cst_47 : f32 to vector<8x128xf32>
    %181 = arith.mulf %180, %179 : vector<8x128xf32>
    %cst_48 = arith.constant 5.000000e-01 : f32
    %182 = vector.broadcast %cst_48 : f32 to vector<8x128xf32>
    %183 = arith.addf %181, %182 : vector<8x128xf32>
    %184 = arith.select %5, %179, %183 : vector<8x128xi1>, vector<8x128xf32>
    %185 = vector.extract_strided_slice %184 {offsets = [0, 0], sizes = [8, 32], strides = [1, 1]} : vector<8x128xf32> to vector<8x32xf32>
    %186 = vector.extract_strided_slice %184 {offsets = [0, 32], sizes = [8, 32], strides = [1, 1]} : vector<8x128xf32> to vector<8x32xf32>
    %187 = vector.extract_strided_slice %184 {offsets = [0, 64], sizes = [8, 32], strides = [1, 1]} : vector<8x128xf32> to vector<8x32xf32>
    %188 = vector.extract_strided_slice %184 {offsets = [0, 96], sizes = [8, 32], strides = [1, 1]} : vector<8x128xf32> to vector<8x32xf32>
    %189 = arith.mulf %186, %151 : vector<8x32xf32>
    %190 = arith.mulf %185, %187 : vector<8x32xf32>
    %191 = arith.addf %189, %190 : vector<8x32xf32>
    %192 = math.tanh %191 : vector<8x32xf32>
    %193 = arith.mulf %188, %192 : vector<8x32xf32>
    %194 = arith.truncf %172 : vector<8x32xf32> to vector<8x32xbf16>
    %cst_49 = arith.constant dense<0.000000e+00> : vector<8x128xf32>
    %195 = tpu.matmul %194, %10, %cst_49 {dimension_numbers = #tpu.dot_dimension_numbers<[1], [0], [0], [1], [0, 0, 1, 1], [], []>} : vector<8x32xbf16>, vector<32x128xbf16>, vector<8x128xf32> -> vector<8x128xf32>
    %196 = arith.addf %41, %195 : vector<8x128xf32>
    %197 = arith.mulf %196, %8 : vector<8x128xf32>
    %198 = math.tanh %197 : vector<8x128xf32>
    %cst_50 = arith.constant 5.000000e-01 : f32
    %199 = vector.broadcast %cst_50 : f32 to vector<8x128xf32>
    %200 = arith.mulf %199, %198 : vector<8x128xf32>
    %cst_51 = arith.constant 5.000000e-01 : f32
    %201 = vector.broadcast %cst_51 : f32 to vector<8x128xf32>
    %202 = arith.addf %200, %201 : vector<8x128xf32>
    %203 = arith.select %5, %198, %202 : vector<8x128xi1>, vector<8x128xf32>
    %204 = vector.extract_strided_slice %203 {offsets = [0, 0], sizes = [8, 32], strides = [1, 1]} : vector<8x128xf32> to vector<8x32xf32>
    %205 = vector.extract_strided_slice %203 {offsets = [0, 32], sizes = [8, 32], strides = [1, 1]} : vector<8x128xf32> to vector<8x32xf32>
    %206 = vector.extract_strided_slice %203 {offsets = [0, 64], sizes = [8, 32], strides = [1, 1]} : vector<8x128xf32> to vector<8x32xf32>
    %207 = vector.extract_strided_slice %203 {offsets = [0, 96], sizes = [8, 32], strides = [1, 1]} : vector<8x128xf32> to vector<8x32xf32>
    %208 = arith.mulf %205, %170 : vector<8x32xf32>
    %209 = arith.mulf %204, %206 : vector<8x32xf32>
    %210 = arith.addf %208, %209 : vector<8x32xf32>
    %211 = math.tanh %210 : vector<8x32xf32>
    %212 = arith.mulf %207, %211 : vector<8x32xf32>
    %213 = tpu.concatenate %212, %193 in 1 : vector<8x32xf32>, vector<8x32xf32> -> vector<8x64xf32>
    %214 = arith.truncf %213 : vector<8x64xf32> to vector<8x64xbf16>
    %cst_52 = arith.constant dense<0.000000e+00> : vector<8x128xf32>
    %215 = tpu.matmul %214, %12, %cst_52 {dimension_numbers = #tpu.dot_dimension_numbers<[1], [0], [0], [1], [0, 0, 1, 1], [], []>} : vector<8x64xbf16>, vector<64x128xbf16>, vector<8x128xf32> -> vector<8x128xf32>
    %216 = vector.broadcast %13 : vector<1x128xf32> to vector<8x128xf32>
    %217 = arith.addf %215, %216 : vector<8x128xf32>
    %218 = arith.mulf %217, %8 : vector<8x128xf32>
    %219 = math.tanh %218 : vector<8x128xf32>
    %cst_53 = arith.constant 5.000000e-01 : f32
    %220 = vector.broadcast %cst_53 : f32 to vector<8x128xf32>
    %221 = arith.mulf %220, %219 : vector<8x128xf32>
    %cst_54 = arith.constant 5.000000e-01 : f32
    %222 = vector.broadcast %cst_54 : f32 to vector<8x128xf32>
    %223 = arith.addf %221, %222 : vector<8x128xf32>
    %224 = arith.select %5, %219, %223 : vector<8x128xi1>, vector<8x128xf32>
    %225 = vector.extract_strided_slice %224 {offsets = [0, 0], sizes = [8, 32], strides = [1, 1]} : vector<8x128xf32> to vector<8x32xf32>
    %226 = vector.extract_strided_slice %224 {offsets = [0, 32], sizes = [8, 32], strides = [1, 1]} : vector<8x128xf32> to vector<8x32xf32>
    %227 = vector.extract_strided_slice %224 {offsets = [0, 64], sizes = [8, 32], strides = [1, 1]} : vector<8x128xf32> to vector<8x32xf32>
    %228 = vector.extract_strided_slice %224 {offsets = [0, 96], sizes = [8, 32], strides = [1, 1]} : vector<8x128xf32> to vector<8x32xf32>
    %229 = arith.mulf %226, %191 : vector<8x32xf32>
    %230 = arith.mulf %225, %227 : vector<8x32xf32>
    %231 = arith.addf %229, %230 : vector<8x32xf32>
    %232 = math.tanh %231 : vector<8x32xf32>
    %233 = arith.mulf %228, %232 : vector<8x32xf32>
    %234 = arith.truncf %212 : vector<8x32xf32> to vector<8x32xbf16>
    %cst_55 = arith.constant dense<0.000000e+00> : vector<8x128xf32>
    %235 = tpu.matmul %234, %10, %cst_55 {dimension_numbers = #tpu.dot_dimension_numbers<[1], [0], [0], [1], [0, 0, 1, 1], [], []>} : vector<8x32xbf16>, vector<32x128xbf16>, vector<8x128xf32> -> vector<8x128xf32>
    %236 = arith.addf %48, %235 : vector<8x128xf32>
    %237 = arith.mulf %236, %8 : vector<8x128xf32>
    %238 = math.tanh %237 : vector<8x128xf32>
    %cst_56 = arith.constant 5.000000e-01 : f32
    %239 = vector.broadcast %cst_56 : f32 to vector<8x128xf32>
    %240 = arith.mulf %239, %238 : vector<8x128xf32>
    %cst_57 = arith.constant 5.000000e-01 : f32
    %241 = vector.broadcast %cst_57 : f32 to vector<8x128xf32>
    %242 = arith.addf %240, %241 : vector<8x128xf32>
    %243 = arith.select %5, %238, %242 : vector<8x128xi1>, vector<8x128xf32>
    %244 = vector.extract_strided_slice %243 {offsets = [0, 0], sizes = [8, 32], strides = [1, 1]} : vector<8x128xf32> to vector<8x32xf32>
    %245 = vector.extract_strided_slice %243 {offsets = [0, 32], sizes = [8, 32], strides = [1, 1]} : vector<8x128xf32> to vector<8x32xf32>
    %246 = vector.extract_strided_slice %243 {offsets = [0, 64], sizes = [8, 32], strides = [1, 1]} : vector<8x128xf32> to vector<8x32xf32>
    %247 = vector.extract_strided_slice %243 {offsets = [0, 96], sizes = [8, 32], strides = [1, 1]} : vector<8x128xf32> to vector<8x32xf32>
    %248 = arith.mulf %245, %210 : vector<8x32xf32>
    %249 = arith.mulf %244, %246 : vector<8x32xf32>
    %250 = arith.addf %248, %249 : vector<8x32xf32>
    %251 = math.tanh %250 : vector<8x32xf32>
    %252 = arith.mulf %247, %251 : vector<8x32xf32>
    %253 = tpu.concatenate %252, %233 in 1 : vector<8x32xf32>, vector<8x32xf32> -> vector<8x64xf32>
    %254 = arith.truncf %253 : vector<8x64xf32> to vector<8x64xbf16>
    %cst_58 = arith.constant dense<0.000000e+00> : vector<8x128xf32>
    %255 = tpu.matmul %254, %12, %cst_58 {dimension_numbers = #tpu.dot_dimension_numbers<[1], [0], [0], [1], [0, 0, 1, 1], [], []>} : vector<8x64xbf16>, vector<64x128xbf16>, vector<8x128xf32> -> vector<8x128xf32>
    %256 = vector.broadcast %13 : vector<1x128xf32> to vector<8x128xf32>
    %257 = arith.addf %255, %256 : vector<8x128xf32>
    %258 = arith.mulf %257, %8 : vector<8x128xf32>
    %259 = math.tanh %258 : vector<8x128xf32>
    %cst_59 = arith.constant 5.000000e-01 : f32
    %260 = vector.broadcast %cst_59 : f32 to vector<8x128xf32>
    %261 = arith.mulf %260, %259 : vector<8x128xf32>
    %cst_60 = arith.constant 5.000000e-01 : f32
    %262 = vector.broadcast %cst_60 : f32 to vector<8x128xf32>
    %263 = arith.addf %261, %262 : vector<8x128xf32>
    %264 = arith.select %5, %259, %263 : vector<8x128xi1>, vector<8x128xf32>
    %265 = vector.extract_strided_slice %264 {offsets = [0, 0], sizes = [8, 32], strides = [1, 1]} : vector<8x128xf32> to vector<8x32xf32>
    %266 = vector.extract_strided_slice %264 {offsets = [0, 32], sizes = [8, 32], strides = [1, 1]} : vector<8x128xf32> to vector<8x32xf32>
    %267 = vector.extract_strided_slice %264 {offsets = [0, 64], sizes = [8, 32], strides = [1, 1]} : vector<8x128xf32> to vector<8x32xf32>
    %268 = vector.extract_strided_slice %264 {offsets = [0, 96], sizes = [8, 32], strides = [1, 1]} : vector<8x128xf32> to vector<8x32xf32>
    %269 = arith.mulf %266, %231 : vector<8x32xf32>
    %270 = arith.mulf %265, %267 : vector<8x32xf32>
    %271 = arith.addf %269, %270 : vector<8x32xf32>
    %272 = math.tanh %271 : vector<8x32xf32>
    %273 = arith.mulf %268, %272 : vector<8x32xf32>
    %274 = arith.truncf %252 : vector<8x32xf32> to vector<8x32xbf16>
    %cst_61 = arith.constant dense<0.000000e+00> : vector<8x128xf32>
    %275 = tpu.matmul %274, %10, %cst_61 {dimension_numbers = #tpu.dot_dimension_numbers<[1], [0], [0], [1], [0, 0, 1, 1], [], []>} : vector<8x32xbf16>, vector<32x128xbf16>, vector<8x128xf32> -> vector<8x128xf32>
    %276 = arith.addf %55, %275 : vector<8x128xf32>
    %277 = arith.mulf %276, %8 : vector<8x128xf32>
    %278 = math.tanh %277 : vector<8x128xf32>
    %cst_62 = arith.constant 5.000000e-01 : f32
    %279 = vector.broadcast %cst_62 : f32 to vector<8x128xf32>
    %280 = arith.mulf %279, %278 : vector<8x128xf32>
    %cst_63 = arith.constant 5.000000e-01 : f32
    %281 = vector.broadcast %cst_63 : f32 to vector<8x128xf32>
    %282 = arith.addf %280, %281 : vector<8x128xf32>
    %283 = arith.select %5, %278, %282 : vector<8x128xi1>, vector<8x128xf32>
    %284 = vector.extract_strided_slice %283 {offsets = [0, 0], sizes = [8, 32], strides = [1, 1]} : vector<8x128xf32> to vector<8x32xf32>
    %285 = vector.extract_strided_slice %283 {offsets = [0, 32], sizes = [8, 32], strides = [1, 1]} : vector<8x128xf32> to vector<8x32xf32>
    %286 = vector.extract_strided_slice %283 {offsets = [0, 64], sizes = [8, 32], strides = [1, 1]} : vector<8x128xf32> to vector<8x32xf32>
    %287 = vector.extract_strided_slice %283 {offsets = [0, 96], sizes = [8, 32], strides = [1, 1]} : vector<8x128xf32> to vector<8x32xf32>
    %288 = arith.mulf %285, %250 : vector<8x32xf32>
    %289 = arith.mulf %284, %286 : vector<8x32xf32>
    %290 = arith.addf %288, %289 : vector<8x32xf32>
    %291 = math.tanh %290 : vector<8x32xf32>
    %292 = arith.mulf %287, %291 : vector<8x32xf32>
    %293 = tpu.concatenate %292, %273 in 1 : vector<8x32xf32>, vector<8x32xf32> -> vector<8x64xf32>
    %294 = arith.truncf %293 : vector<8x64xf32> to vector<8x64xbf16>
    %cst_64 = arith.constant dense<0.000000e+00> : vector<8x128xf32>
    %295 = tpu.matmul %294, %12, %cst_64 {dimension_numbers = #tpu.dot_dimension_numbers<[1], [0], [0], [1], [0, 0, 1, 1], [], []>} : vector<8x64xbf16>, vector<64x128xbf16>, vector<8x128xf32> -> vector<8x128xf32>
    %296 = vector.broadcast %13 : vector<1x128xf32> to vector<8x128xf32>
    %297 = arith.addf %295, %296 : vector<8x128xf32>
    %298 = arith.mulf %297, %8 : vector<8x128xf32>
    %299 = math.tanh %298 : vector<8x128xf32>
    %cst_65 = arith.constant 5.000000e-01 : f32
    %300 = vector.broadcast %cst_65 : f32 to vector<8x128xf32>
    %301 = arith.mulf %300, %299 : vector<8x128xf32>
    %cst_66 = arith.constant 5.000000e-01 : f32
    %302 = vector.broadcast %cst_66 : f32 to vector<8x128xf32>
    %303 = arith.addf %301, %302 : vector<8x128xf32>
    %304 = arith.select %5, %299, %303 : vector<8x128xi1>, vector<8x128xf32>
    %305 = vector.extract_strided_slice %304 {offsets = [0, 0], sizes = [8, 32], strides = [1, 1]} : vector<8x128xf32> to vector<8x32xf32>
    %306 = vector.extract_strided_slice %304 {offsets = [0, 32], sizes = [8, 32], strides = [1, 1]} : vector<8x128xf32> to vector<8x32xf32>
    %307 = vector.extract_strided_slice %304 {offsets = [0, 64], sizes = [8, 32], strides = [1, 1]} : vector<8x128xf32> to vector<8x32xf32>
    %308 = vector.extract_strided_slice %304 {offsets = [0, 96], sizes = [8, 32], strides = [1, 1]} : vector<8x128xf32> to vector<8x32xf32>
    %309 = arith.mulf %306, %271 : vector<8x32xf32>
    %310 = arith.mulf %305, %307 : vector<8x32xf32>
    %311 = arith.addf %309, %310 : vector<8x32xf32>
    %312 = math.tanh %311 : vector<8x32xf32>
    %313 = arith.mulf %308, %312 : vector<8x32xf32>
    %314 = arith.truncf %292 : vector<8x32xf32> to vector<8x32xbf16>
    %cst_67 = arith.constant dense<0.000000e+00> : vector<8x128xf32>
    %315 = tpu.matmul %314, %10, %cst_67 {dimension_numbers = #tpu.dot_dimension_numbers<[1], [0], [0], [1], [0, 0, 1, 1], [], []>} : vector<8x32xbf16>, vector<32x128xbf16>, vector<8x128xf32> -> vector<8x128xf32>
    %316 = arith.addf %62, %315 : vector<8x128xf32>
    %317 = arith.mulf %316, %8 : vector<8x128xf32>
    %318 = math.tanh %317 : vector<8x128xf32>
    %cst_68 = arith.constant 5.000000e-01 : f32
    %319 = vector.broadcast %cst_68 : f32 to vector<8x128xf32>
    %320 = arith.mulf %319, %318 : vector<8x128xf32>
    %cst_69 = arith.constant 5.000000e-01 : f32
    %321 = vector.broadcast %cst_69 : f32 to vector<8x128xf32>
    %322 = arith.addf %320, %321 : vector<8x128xf32>
    %323 = arith.select %5, %318, %322 : vector<8x128xi1>, vector<8x128xf32>
    %324 = vector.extract_strided_slice %323 {offsets = [0, 0], sizes = [8, 32], strides = [1, 1]} : vector<8x128xf32> to vector<8x32xf32>
    %325 = vector.extract_strided_slice %323 {offsets = [0, 32], sizes = [8, 32], strides = [1, 1]} : vector<8x128xf32> to vector<8x32xf32>
    %326 = vector.extract_strided_slice %323 {offsets = [0, 64], sizes = [8, 32], strides = [1, 1]} : vector<8x128xf32> to vector<8x32xf32>
    %327 = vector.extract_strided_slice %323 {offsets = [0, 96], sizes = [8, 32], strides = [1, 1]} : vector<8x128xf32> to vector<8x32xf32>
    %328 = arith.mulf %325, %290 : vector<8x32xf32>
    %329 = arith.mulf %324, %326 : vector<8x32xf32>
    %330 = arith.addf %328, %329 : vector<8x32xf32>
    %331 = math.tanh %330 : vector<8x32xf32>
    %332 = arith.mulf %327, %331 : vector<8x32xf32>
    %333 = tpu.concatenate %332, %313 in 1 : vector<8x32xf32>, vector<8x32xf32> -> vector<8x64xf32>
    %334 = arith.truncf %333 : vector<8x64xf32> to vector<8x64xbf16>
    %cst_70 = arith.constant dense<0.000000e+00> : vector<8x128xf32>
    %335 = tpu.matmul %334, %12, %cst_70 {dimension_numbers = #tpu.dot_dimension_numbers<[1], [0], [0], [1], [0, 0, 1, 1], [], []>} : vector<8x64xbf16>, vector<64x128xbf16>, vector<8x128xf32> -> vector<8x128xf32>
    %336 = vector.broadcast %13 : vector<1x128xf32> to vector<8x128xf32>
    %337 = arith.addf %335, %336 : vector<8x128xf32>
    %338 = arith.mulf %337, %8 : vector<8x128xf32>
    %339 = math.tanh %338 : vector<8x128xf32>
    %cst_71 = arith.constant 5.000000e-01 : f32
    %340 = vector.broadcast %cst_71 : f32 to vector<8x128xf32>
    %341 = arith.mulf %340, %339 : vector<8x128xf32>
    %cst_72 = arith.constant 5.000000e-01 : f32
    %342 = vector.broadcast %cst_72 : f32 to vector<8x128xf32>
    %343 = arith.addf %341, %342 : vector<8x128xf32>
    %344 = arith.select %5, %339, %343 : vector<8x128xi1>, vector<8x128xf32>
    %345 = vector.extract_strided_slice %344 {offsets = [0, 0], sizes = [8, 32], strides = [1, 1]} : vector<8x128xf32> to vector<8x32xf32>
    %346 = vector.extract_strided_slice %344 {offsets = [0, 32], sizes = [8, 32], strides = [1, 1]} : vector<8x128xf32> to vector<8x32xf32>
    %347 = vector.extract_strided_slice %344 {offsets = [0, 64], sizes = [8, 32], strides = [1, 1]} : vector<8x128xf32> to vector<8x32xf32>
    %348 = vector.extract_strided_slice %344 {offsets = [0, 96], sizes = [8, 32], strides = [1, 1]} : vector<8x128xf32> to vector<8x32xf32>
    %349 = arith.mulf %346, %311 : vector<8x32xf32>
    %350 = arith.mulf %345, %347 : vector<8x32xf32>
    %351 = arith.addf %349, %350 : vector<8x32xf32>
    %352 = math.tanh %351 : vector<8x32xf32>
    %353 = arith.mulf %348, %352 : vector<8x32xf32>
    %354 = arith.truncf %332 : vector<8x32xf32> to vector<8x32xbf16>
    %cst_73 = arith.constant dense<0.000000e+00> : vector<8x128xf32>
    %355 = tpu.matmul %354, %10, %cst_73 {dimension_numbers = #tpu.dot_dimension_numbers<[1], [0], [0], [1], [0, 0, 1, 1], [], []>} : vector<8x32xbf16>, vector<32x128xbf16>, vector<8x128xf32> -> vector<8x128xf32>
    %356 = arith.addf %69, %355 : vector<8x128xf32>
    %357 = arith.mulf %356, %8 : vector<8x128xf32>
    %358 = math.tanh %357 : vector<8x128xf32>
    %cst_74 = arith.constant 5.000000e-01 : f32
    %359 = vector.broadcast %cst_74 : f32 to vector<8x128xf32>
    %360 = arith.mulf %359, %358 : vector<8x128xf32>
    %cst_75 = arith.constant 5.000000e-01 : f32
    %361 = vector.broadcast %cst_75 : f32 to vector<8x128xf32>
    %362 = arith.addf %360, %361 : vector<8x128xf32>
    %363 = arith.select %5, %358, %362 : vector<8x128xi1>, vector<8x128xf32>
    %364 = vector.extract_strided_slice %363 {offsets = [0, 0], sizes = [8, 32], strides = [1, 1]} : vector<8x128xf32> to vector<8x32xf32>
    %365 = vector.extract_strided_slice %363 {offsets = [0, 32], sizes = [8, 32], strides = [1, 1]} : vector<8x128xf32> to vector<8x32xf32>
    %366 = vector.extract_strided_slice %363 {offsets = [0, 64], sizes = [8, 32], strides = [1, 1]} : vector<8x128xf32> to vector<8x32xf32>
    %367 = vector.extract_strided_slice %363 {offsets = [0, 96], sizes = [8, 32], strides = [1, 1]} : vector<8x128xf32> to vector<8x32xf32>
    %368 = arith.mulf %365, %330 : vector<8x32xf32>
    %369 = arith.mulf %364, %366 : vector<8x32xf32>
    %370 = arith.addf %368, %369 : vector<8x32xf32>
    %371 = math.tanh %370 : vector<8x32xf32>
    %372 = arith.mulf %367, %371 : vector<8x32xf32>
    %373 = tpu.concatenate %372, %353 in 1 : vector<8x32xf32>, vector<8x32xf32> -> vector<8x64xf32>
    %374 = arith.truncf %373 : vector<8x64xf32> to vector<8x64xbf16>
    %cst_76 = arith.constant dense<0.000000e+00> : vector<8x128xf32>
    %375 = tpu.matmul %374, %12, %cst_76 {dimension_numbers = #tpu.dot_dimension_numbers<[1], [0], [0], [1], [0, 0, 1, 1], [], []>} : vector<8x64xbf16>, vector<64x128xbf16>, vector<8x128xf32> -> vector<8x128xf32>
    %376 = vector.broadcast %13 : vector<1x128xf32> to vector<8x128xf32>
    %377 = arith.addf %375, %376 : vector<8x128xf32>
    %378 = arith.mulf %377, %8 : vector<8x128xf32>
    %379 = math.tanh %378 : vector<8x128xf32>
    %cst_77 = arith.constant 5.000000e-01 : f32
    %380 = vector.broadcast %cst_77 : f32 to vector<8x128xf32>
    %381 = arith.mulf %380, %379 : vector<8x128xf32>
    %cst_78 = arith.constant 5.000000e-01 : f32
    %382 = vector.broadcast %cst_78 : f32 to vector<8x128xf32>
    %383 = arith.addf %381, %382 : vector<8x128xf32>
    %384 = arith.select %5, %379, %383 : vector<8x128xi1>, vector<8x128xf32>
    %385 = vector.extract_strided_slice %384 {offsets = [0, 0], sizes = [8, 32], strides = [1, 1]} : vector<8x128xf32> to vector<8x32xf32>
    %386 = vector.extract_strided_slice %384 {offsets = [0, 32], sizes = [8, 32], strides = [1, 1]} : vector<8x128xf32> to vector<8x32xf32>
    %387 = vector.extract_strided_slice %384 {offsets = [0, 64], sizes = [8, 32], strides = [1, 1]} : vector<8x128xf32> to vector<8x32xf32>
    %388 = vector.extract_strided_slice %384 {offsets = [0, 96], sizes = [8, 32], strides = [1, 1]} : vector<8x128xf32> to vector<8x32xf32>
    %389 = arith.mulf %386, %351 : vector<8x32xf32>
    %390 = arith.mulf %385, %387 : vector<8x32xf32>
    %391 = arith.addf %389, %390 : vector<8x32xf32>
    %392 = math.tanh %391 : vector<8x32xf32>
    %393 = arith.mulf %388, %392 : vector<8x32xf32>
    %394 = arith.truncf %393 : vector<8x32xf32> to vector<8x32xbf16>
    %c0_79 = arith.constant 0 : index
    %c0_80 = arith.constant 0 : index
    %395 = vector.load %arg7[%c0_79, %c0_80] : memref<32x128xbf16, #tpu.memory_space<vmem>>, vector<32x128xbf16>
    %cst_81 = arith.constant dense<0.000000e+00> : vector<8x128xf32>
    %396 = tpu.matmul %394, %395, %cst_81 {dimension_numbers = #tpu.dot_dimension_numbers<[1], [0], [0], [1], [0, 0, 1, 1], [], []>} : vector<8x32xbf16>, vector<32x128xbf16>, vector<8x128xf32> -> vector<8x128xf32>
    %c0_82 = arith.constant 0 : index
    %c0_83 = arith.constant 0 : index
    %397 = vector.load %arg8[%c0_82, %c0_83] : memref<1x128xf32, #tpu.memory_space<vmem>>, vector<1x128xf32>
    %398 = vector.broadcast %397 : vector<1x128xf32> to vector<8x128xf32>
    %399 = arith.addf %396, %398 : vector<8x128xf32>
    %c0_84 = arith.constant 0 : index
    %c0_85 = arith.constant 0 : index
    %400 = vector.load %arg9[%c0_84, %c0_85] : memref<8x128xf32, #tpu.memory_space<vmem>>, vector<8x128xf32>
    tpu.vector_store %arg9[%c0_84, %c0_85], %399 {strides = array<i32>} : memref<8x128xf32, #tpu.memory_space<vmem>>, vector<8x128xf32>,
    return
  }
  func.func @transform_0(%arg0: i32) -> (i32, i32, i32) {
    %c0_i32 = arith.constant 0 : i32
    %c0_i32_0 = arith.constant 0 : i32
    %c0_i32_1 = arith.constant 0 : i32
    return %c0_i32, %arg0, %c0_i32_0 : i32, i32, i32
  }
  func.func @transform_1(%arg0: i32) -> (i32, i32) {
    %c0_i32 = arith.constant 0 : i32
    %c0_i32_0 = arith.constant 0 : i32
    %c0_i32_1 = arith.constant 0 : i32
    return %c0_i32, %c0_i32_0 : i32, i32
  }
  func.func @transform_2(%arg0: i32) -> (i32, i32) {
    %c0_i32 = arith.constant 0 : i32
    %c0_i32_0 = arith.constant 0 : i32
    %c0_i32_1 = arith.constant 0 : i32
    return %c0_i32, %c0_i32_0 : i32, i32
  }
  func.func @transform_3(%arg0: i32) -> (i32, i32) {
    %c0_i32 = arith.constant 0 : i32
    %c0_i32_0 = arith.constant 0 : i32
    %c0_i32_1 = arith.constant 0 : i32
    return %c0_i32, %c0_i32_0 : i32, i32
  }
  func.func @transform_4(%arg0: i32) -> (i32, i32) {
    %c0_i32 = arith.constant 0 : i32
    %c0_i32_0 = arith.constant 0 : i32
    %c0_i32_1 = arith.constant 0 : i32
    return %c0_i32, %c0_i32_0 : i32, i32
  }
  func.func @transform_5(%arg0: i32) -> (i32, i32) {
    %c0_i32 = arith.constant 0 : i32
    %c0_i32_0 = arith.constant 0 : i32
    %c0_i32_1 = arith.constant 0 : i32
    return %c0_i32, %c0_i32_0 : i32, i32
  }
  func.func @transform_6(%arg0: i32) -> (i32, i32) {
    %c0_i32 = arith.constant 0 : i32
    %c0_i32_0 = arith.constant 0 : i32
    %c0_i32_1 = arith.constant 0 : i32
    return %c0_i32, %c0_i32_0 : i32, i32
  }
  func.func @transform_7(%arg0: i32) -> (i32, i32) {
    %c0_i32 = arith.constant 0 : i32
    %c0_i32_0 = arith.constant 0 : i32
    %c0_i32_1 = arith.constant 0 : i32
    return %c0_i32, %c0_i32_0 : i32, i32
  }
  func.func @transform_8(%arg0: i32) -> (i32, i32) {
    %c0_i32 = arith.constant 0 : i32
    %c0_i32_0 = arith.constant 0 : i32
    return %arg0, %c0_i32 : i32, i32
  }
}

</mosaic_0001>

<bundles_post_ra>
// kernel: deeplog_forward.1
= control target key start
LH: loop header
LB: loop body
LE: loop exit
PB: predicated region body
PF: predicated region fallthrough
CT: control target
= control target key end

     0   :  { %v1756_v0 = vmov 0.0   ;;  %vm1757_vm0 = vmmov 0   ;;  %v1758_v2 = vmov 0   ;;  %v30_v5 = vlaneseq  ;;  %s1760_s14 = smov 64   ;;  %s1761_s15 = smov 32   ;;  %s2251_s2 = inlined_call_operand.vmem [shape: bf16[32,128], index: 2, kind: input, shape index: {}]   ;;  %s2252_s0 = inlined_call_operand.vmem [shape: f32[8,8,1], index: 0, kind: input, shape index: {}]   ;;  %s2253_s1 = inlined_call_operand.vmem [shape: f32[1,128], index: 1, kind: input, shape index: {}]   ;;  %s2254_s3 = inlined_call_operand.vmem [shape: f32[1,128], index: 3, kind: input, shape index: {}]   ;;  %s2255_s4 = inlined_call_operand.vmem [shape: bf16[64,128], index: 4, kind: input, shape index: {}]   ;;  %s2256_s5 = inlined_call_operand.vmem [shape: f32[1,128], index: 5, kind: input, shape index: {}]   ;;  %s2257_s6 = inlined_call_operand.vmem [shape: bf16[32,128], index: 6, kind: input, shape index: {}]   ;;  %s2258_s7 = inlined_call_operand.vmem [shape: f32[1,128], index: 7, kind: input, shape index: {}]   ;;  %s2259_s8 = inlined_call_operand.vmem [shape: f32[8,128], index: 8, kind: output, shape index: {}]  }
   0x1   :  { %1507 = vmatprep.subr.bf16.mxu0 %v1756_v0  ;;  %v1811_v1 = vld [vmem:[%s2251_s2] sm:$0xff]   ;;  %1511 = vmatprep.mubr.msk.bf16.mxu0 %vm1757_vm0, %v1756_v0  ;;  %v1820_v3 = vld [vmem:[%s2251_s2 + $0x8] sm:$0xff]   ;;  %v1759_v13 = vmov 0.5   ;;  %v1881_v33 = vld [vmem:[%s2255_s4 + $0x10] sm:$0xff]   ;;  %vm146_vm4 = vcmask 261120   ;;  %vm249_vm5 = vcmask 523264  }
   0x2   :  { %1681 = vset.pattern.permute.xlu0 %v1758_v2  ;;  %1515 = vmatprep.subr.bf16.mxu1 %v1756_v0  ;;  %v51_v4 = vld [vmem:[%s2252_s0] sm:$0xff]  ;;  %v31_v8 = vand.u32 127, %v30_v5  ;;  %v1873_v31 = vld [vmem:[%s2255_s4 + $0x8] sm:$0xff]   ;;  %v1889_v34 = vld [vmem:[%s2255_s4 + $0x18] sm:$0xff]  }
   0x3   :  { %1508 = vmatpush3.bf16.msra.mxu0 %v1811_v1  ;;  %1523 = vmatprep.mubr.msk.bf16.mxu1 %vm1757_vm0, %v1756_v0  ;;  %v1839_v6 = vld [vmem:[%s2253_s1] ss:$0 sm:$0xff]  ;;  %v1407_v38 = vld [vmem:[%s2252_s0 + $0x8] sm:$0xff] }
   0x4   :  { %1509 = vmatprep.subr.bf16.mxu0 %v1756_v0  ;;  %54 = vperm.xlu0 %1681, %v51_v4   ;;  %vm32_vm1 = vcmp.ge.s32.totalorder %v31_v8, 64  ;;  %vm33_vm2 = vcmp.lt.s32.totalorder %v31_v8, 96  ;;  %v1845_v10 = vld [vmem:[%s2254_s3] ss:$0 sm:$0xff]  ;;  %v1689_v11 = vld [vmem:[%s2257_s6 + $0x8] sm:$0xff]  }
   0x5   :  { %vm1847_vm3 = vmand %vm32_vm1, %vm33_vm2  ;;  %v1867_v30 = vld [vmem:[%s2255_s4] sm:$0xff]  }
   0x6   :  { %v1854_v14 = vsel %vm1847_vm3, 1.0, %v1759_v13  ;;  %1516 = vmatpush3.bf16.msra.mxu1 %v1867_v30  ;;  %v1922_v46 = vld [vmem:[%s2256_s5] ss:$0 sm:$0xff] }
   0x7   :  { %1510 = vmatpush3.bf16.msra.mxu0 %v1820_v3  ;;  %1517 = vmatprep.subr.bf16.mxu1 %v1756_v0 }
   0x8   :  { %1527 = vmatprep.subr.bf16.mxu0 %v1756_v0 }
   0xa   :  { %1512 = vmatmul.mubr.bf16.vlgmr.msra.gmra.mrb[0].mxu0 %v1758_v2  ;;  %1518 = vmatpush3.bf16.msra.mxu1 %v1873_v31 }
   0xb   :  { %1528 = vmatpush3.bf16.msra.mxu0 %v1811_v1  ;;  %1531 = vmatprep.mubr.msk.bf16.mxu0 %vm1757_vm0, %v1756_v0 }
   0xc   :  { %1529 = vmatprep.subr.bf16.mxu0 %v1756_v0  ;;  %1519 = vmatprep.subr.bf16.mxu1 %v1756_v0 }
   0xe   :  { %1520 = vmatpush3.bf16.msra.mxu1 %v1881_v33 }
   0xf   :  { %1530 = vmatpush3.bf16.msra.mxu0 %v1820_v3  ;;  %1521 = vmatprep.subr.bf16.mxu1 %v1756_v0 }
  0x10   :  { %1535 = vmatprep.subr.bf16.mxu0 %v1756_v0 }
  0x12   :  { %1522 = vmatpush3.bf16.msra.mxu1 %v1889_v34 }
  0x13   :  { %1547 = vmatprep.subr.bf16.mxu1 %v1756_v0 }
  0x83   :  { %v55_v7 = vpop.permute.xlu0 %54 }
  0x84   :  { %v63_v9 = vmul.f32 %v1839_v6, %v55_v7 }
  0x86   :  { %v70_v12 = vadd.f32 %v1845_v10, %v63_v9 }
  0xdd   :  { %v184_v15 = vpop.f32.mrb[0].mxu0 }
  0xde   :  { %v190_v16 = vadd.f32 %v184_v15, %v70_v12  ;;  %v1513_v17 = vpop.f32.mrb[1].mxu0 }
  0xdf   :  { %v187_v18 = vpop.f32.mrb[2].mxu0 }
  0xe0   :  { %v191_v19 = vmul.f32 %v190_v16, %v1854_v14  ;;  %v1514_v20 = vpop.f32.mrb[3].mxu0 }
  0xe2   :  { %1690 = vtanh.f32 %v191_v19 }
  0xec   :  { %v1691_v21 = vpop.eup %1690 }
  0xed   :  { %v193_v22 = vmul.f32 0.5, %v1691_v21 }
  0xef   :  { %v194_v23 = vadd.f32 0.5, %v193_v22 }
  0xf1   :  { %v195_v24 = vsel %vm1847_vm3, %v1691_v21, %v194_v23 }
  0xf2   :  { %198 = vrot.lane.b32.xlu0 %v195_v24, %s1760_s14  ;;  %v196_v27 = vmul.f32 0.0, %v195_v24 }
 0x164   :  { %v199_v25 = vpop.permute.xlu0 %198 }
 0x165   :  { %v201_v26 = vmul.f32 %v199_v25, %v195_v24 }
 0x167   :  { %203 = vrot.lane.b32.xlu1 %v201_v26, %s1761_s15 }
 0x1d9   :  { %v204_v28 = vpop.permute.xlu1 %203 }
 0x1da   :  { %v1861_v29 = vadd.f32 %v204_v28, %v196_v27  ;;  %v1408_v27 = vld [vmem:[%s2252_s0 + $0x10] sm:$0xff] }
 0x1dc   :  { %1692 = vtanh.f32 %v1861_v29 }
 0x1e6   :  { %v1693_v32 = vpop.eup %1692 }
 0x1e7   :  { %209 = vrot.lane.b32.xlu1 %v1693_v32, %s1760_s14 }
 0x259   :  { %v210_v35 = vpop.permute.xlu1 %209 }
 0x25a   :  { %v212_v36 = vmul.f32 %v210_v35, %v195_v24 }
 0x25c   :  { %v315_v37 = vpack.c.bf16 %v212_v36, %v212_v36  ;;  %214 = vrot.lane.b32.xlu0 %v212_v36, %s1761_s15 }
 0x25e   :  { %317 = vrot.lane.b32.xlu1 %v315_v37, %s1761_s15 }
 0x260   :  { %75 = vperm.xlu0 %1681, %v1407_v38  }
 0x2ce   :  { %v215_v39 = vpop.permute.xlu0 %214 }
 0x2cf   :  { %v217_v40 = vsel %vm146_vm4, %v215_v39, 0.0 }
 0x2d0   :  { %v218_v41 = vpack.c.bf16 %v217_v40, %v217_v40  ;;  %v318_v42 = vpop.permute.xlu1 %317 }
 0x2d1   :  { %1532 = vmatmul.mubr.msk.bf16.vlgmr.msra.gmra.mrb[4].mxu0 %vm146_vm4, %v318_v42 }
 0x2d2   :  { %1524 = vmatmul.mubr.msk.bf16.vlgmr.msra.gmra.mrb[0].mxu1 %vm249_vm5, %v218_v41  ;;  %1536 = vmatpush3.bf16.msra.mxu0 %v1867_v30 }
 0x2d3   :  { %1537 = vmatprep.subr.bf16.mxu0 %v1756_v0  ;;  %1548 = vmatpush3.bf16.msra.mxu1 %v1811_v1 }
 0x2d4   :  { %1549 = vmatprep.subr.bf16.mxu1 %v1756_v0  ;;  %1543 = vmatprep.mubr.msk.bf16.mxu0 %vm1757_vm0, %v1756_v0 }
 0x2d5   :  { %1551 = vmatprep.mubr.msk.bf16.mxu1 %vm1757_vm0, %v1756_v0 }
 0x2d6   :  { %1538 = vmatpush3.bf16.msra.mxu0 %v1873_v31 }
 0x2d7   :  { %1539 = vmatprep.subr.bf16.mxu0 %v1756_v0  ;;  %1550 = vmatpush3.bf16.msra.mxu1 %v1820_v3 }
 0x2d8   :  { %1555 = vmatprep.subr.bf16.mxu1 %v1756_v0 }
 0x2da   :  { %1540 = vmatpush3.bf16.msra.mxu0 %v1881_v33 }
 0x2db   :  { %1541 = vmatprep.subr.bf16.mxu0 %v1756_v0 }
 0x2de   :  { %1542 = vmatpush3.bf16.msra.mxu0 %v1889_v34 }
 0x2df   :  { %1567 = vmatprep.subr.bf16.mxu0 %v1756_v0  ;;  %v76_v43 = vpop.permute.xlu0 %75 }
 0x2e0   :  { %v78_v44 = vmul.f32 %v1839_v6, %v76_v43 }
 0x2e2   :  { %v79_v45 = vadd.f32 %v1845_v10, %v78_v44 }
 0x3a4   :  { %v356_v47 = vpop.f32.mrb[4].mxu0 }
 0x3a5   :  { %v362_v48 = vadd.f32 %v356_v47, %v79_v45  ;;  %v287_v49 = vpop.f32.mrb[0].mxu1  ;;  %v1533_v50 = vpop.f32.mrb[5].mxu0 }
 0x3a6   :  { %v288_v51 = vadd.f32 %v1922_v46, %v287_v49  ;;  %v1525_v52 = vpop.f32.mrb[1].mxu1  ;;  %v359_v53 = vpop.f32.mrb[6].mxu0 }
 0x3a7   :  { %v363_v54 = vmul.f32 %v362_v48, %v1854_v14  ;;  %v290_v55 = vpop.f32.mrb[2].mxu1  ;;  %v1534_v56 = vpop.f32.mrb[7].mxu0 }
 0x3a8   :  { %v293_v57 = vmul.f32 %v288_v51, %v1854_v14  ;;  %v1526_v58 = vpop.f32.mrb[3].mxu1 }
 0x3a9   :  { %1694 = vtanh.f32 %v363_v54 }
 0x3aa   :  { %1696 = vtanh.f32 %v293_v57 }
 0x3b3   :  { %v1695_v59 = vpop.eup %1694 }
 0x3b4   :  { %v1697_v60 = vpop.eup %1696  ;;  %v365_v61 = vmul.f32 0.5, %v1695_v59 }
 0x3b5   :  { %v295_v62 = vmul.f32 0.5, %v1697_v60 }
 0x3b6   :  { %v366_v63 = vadd.f32 0.5, %v365_v61 }
 0x3b7   :  { %v296_v2 = vadd.f32 0.5, %v295_v62 }
 0x3b8   :  { %v367_v4 = vsel %vm1847_vm3, %v1695_v59, %v366_v63 }
 0x3b9   :  { %370 = vrot.lane.b32.xlu0 %v367_v4, %s1760_s14  ;;  %v297_v5 = vsel %vm1847_vm3, %v1697_v60, %v296_v2  ;;  %v368_v13 = vmul.f32 %v367_v4, %v1861_v29 }
 0x3ba   :  { %300 = vrot.lane.b32.xlu1 %v297_v5, %s1760_s14  ;;  %v298_v16 = vmul.f32 0.0, %v297_v5 }
 0x42b   :  { %v371_v7 = vpop.permute.xlu0 %370 }
 0x42c   :  { %v373_v8 = vmul.f32 %v371_v7, %v367_v4  ;;  %v301_v9 = vpop.permute.xlu1 %300 }
 0x42d   :  { %v303_v12 = vmul.f32 %v301_v9, %v297_v5 }
 0x42e   :  { %375 = vrot.lane.b32.xlu0 %v373_v8, %s1761_s15 }
 0x42f   :  { %305 = vrot.lane.b32.xlu1 %v303_v12, %s1761_s15 }
 0x4a0   :  { %v376_v15 = vpop.permute.xlu0 %375 }
 0x4a1   :  { %v1936_v17 = vadd.f32 %v376_v15, %v368_v13  ;;  %v306_v18 = vpop.permute.xlu1 %305 }
 0x4a2   :  { %v1938_v19 = vadd.f32 %v306_v18, %v298_v16 }
 0x4a3   :  { %1698 = vtanh.f32 %v1936_v17 }
 0x4a4   :  { %1700 = vtanh.f32 %v1938_v19 }
 0x4ad   :  { %v1699_v20 = vpop.eup %1698 }
 0x4ae   :  { %v1701_v21 = vpop.eup %1700  ;;  %381 = vrot.lane.b32.xlu0 %v1699_v20, %s1760_s14  ;;  %v1409_v20 = vld [vmem:[%s2252_s0 + $0x18] sm:$0xff] }
 0x4af   :  { %311 = vrot.lane.b32.xlu1 %v1701_v21, %s1760_s14 }
 0x520   :  { %v382_v22 = vpop.permute.xlu0 %381 }
 0x521   :  { %v384_v23 = vmul.f32 %v382_v22, %v367_v4  ;;  %v312_v24 = vpop.permute.xlu1 %311 }
 0x522   :  { %v314_v25 = vmul.f32 %v312_v24, %v297_v5 }
 0x523   :  { %386 = vrot.lane.b32.xlu1 %v384_v23, %s1761_s15  ;;  %v460_v26 = vpack.c.bf16 %v384_v23, %v384_v23 }
 0x524   :  { %390 = vrot.lane.b32.xlu0 %v314_v25, %s1760_s14 }
 0x527   :  { %462 = vrot.lane.b32.xlu1 %v460_v26, %s1761_s15 }
 0x528   :  { %84 = vperm.xlu0 %1681, %v1408_v27  }
 0x595   :  { %v387_v28 = vpop.permute.xlu1 %386 }
 0x596   :  { %v391_v29 = vpop.permute.xlu0 %390 }
 0x597   :  { %v393_v32 = vsel %vm146_vm4, %v387_v28, %v391_v29 }
 0x598   :  { %v394_v35 = vpack.c.bf16 %v393_v32, %v393_v32 }
 0x599   :  { %v463_v36 = vpop.permute.xlu1 %462 }
 0x59a   :  { %1544 = vmatmul.mubr.msk.bf16.vlgmr.msra.gmra.mrb[8].mxu0 %vm249_vm5, %v394_v35  ;;  %1552 = vmatmul.mubr.msk.bf16.vlgmr.msra.gmra.mrb[4].mxu1 %vm146_vm4, %v463_v36 }
 0x59b   :  { %1556 = vmatpush3.bf16.msra.mxu1 %v1867_v30  ;;  %1568 = vmatpush3.bf16.msra.mxu0 %v1811_v1 }
 0x59c   :  { %1557 = vmatprep.subr.bf16.mxu1 %v1756_v0  ;;  %1569 = vmatprep.subr.bf16.mxu0 %v1756_v0 }
 0x59d   :  { %1563 = vmatprep.mubr.msk.bf16.mxu1 %vm1757_vm0, %v1756_v0  ;;  %1571 = vmatprep.mubr.msk.bf16.mxu0 %vm1757_vm0, %v1756_v0 }
 0x59f   :  { %1558 = vmatpush3.bf16.msra.mxu1 %v1873_v31  ;;  %1570 = vmatpush3.bf16.msra.mxu0 %v1820_v3 }
 0x5a0   :  { %1559 = vmatprep.subr.bf16.mxu1 %v1756_v0  ;;  %1575 = vmatprep.subr.bf16.mxu0 %v1756_v0 }
 0x5a3   :  { %1560 = vmatpush3.bf16.msra.mxu1 %v1881_v33 }
 0x5a4   :  { %1561 = vmatprep.subr.bf16.mxu1 %v1756_v0 }
 0x5a7   :  { %1562 = vmatpush3.bf16.msra.mxu1 %v1889_v34  ;;  %v85_v37 = vpop.permute.xlu0 %84 }
 0x5a8   :  { %1587 = vmatprep.subr.bf16.mxu1 %v1756_v0  ;;  %v87_v38 = vmul.f32 %v1839_v6, %v85_v37 }
 0x5aa   :  { %v88_v39 = vadd.f32 %v1845_v10, %v87_v38 }
 0x66d   :  { %v432_v40 = vpop.f32.mrb[8].mxu0  ;;  %v501_v41 = vpop.f32.mrb[4].mxu1 }
 0x66e   :  { %v433_v42 = vadd.f32 %v1922_v46, %v432_v40  ;;  %v507_v43 = vadd.f32 %v501_v41, %v88_v39  ;;  %v1545_v44 = vpop.f32.mrb[9].mxu0  ;;  %v1553_v45 = vpop.f32.mrb[5].mxu1 }
 0x66f   :  { %v435_v47 = vpop.f32.mrb[10].mxu0  ;;  %v504_v48 = vpop.f32.mrb[6].mxu1 }
 0x670   :  { %v438_v49 = vmul.f32 %v433_v42, %v1854_v14  ;;  %v508_v50 = vmul.f32 %v507_v43, %v1854_v14  ;;  %v1546_v51 = vpop.f32.mrb[11].mxu0  ;;  %v1554_v52 = vpop.f32.mrb[7].mxu1 }
 0x672   :  { %1702 = vtanh.f32 %v438_v49 }
 0x673   :  { %1704 = vtanh.f32 %v508_v50 }
 0x67c   :  { %v1703_v53 = vpop.eup %1702 }
 0x67d   :  { %v1705_v54 = vpop.eup %1704  ;;  %v440_v55 = vmul.f32 0.5, %v1703_v53 }
 0x67e   :  { %v510_v56 = vmul.f32 0.5, %v1705_v54 }
 0x67f   :  { %v441_v57 = vadd.f32 0.5, %v440_v55 }
 0x680   :  { %v511_v58 = vadd.f32 0.5, %v510_v56 }
 0x681   :  { %v442_v59 = vsel %vm1847_vm3, %v1703_v53, %v441_v57 }
 0x682   :  { %445 = vrot.lane.b32.xlu1 %v442_v59, %s1760_s14  ;;  %v512_v60 = vsel %vm1847_vm3, %v1705_v54, %v511_v58  ;;  %v443_v4 = vmul.f32 %v442_v59, %v1938_v19 }
 0x683   :  { %515 = vrot.lane.b32.xlu0 %v512_v60, %s1760_s14  ;;  %v513_v5 = vmul.f32 %v512_v60, %v1936_v17 }
 0x6f4   :  { %v446_v61 = vpop.permute.xlu1 %445 }
 0x6f5   :  { %v516_v62 = vpop.permute.xlu0 %515  ;;  %v448_v63 = vmul.f32 %v446_v61, %v442_v59 }
 0x6f6   :  { %v518_v2 = vmul.f32 %v516_v62, %v512_v60 }
 0x6f7   :  { %450 = vrot.lane.b32.xlu1 %v448_v63, %s1761_s15 }
 0x6f8   :  { %520 = vrot.lane.b32.xlu0 %v518_v2, %s1761_s15 }
 0x769   :  { %v451_v7 = vpop.permute.xlu1 %450 }
 0x76a   :  { %v521_v8 = vpop.permute.xlu0 %520  ;;  %v1984_v9 = vadd.f32 %v451_v7, %v443_v4 }
 0x76b   :  { %v1986_v12 = vadd.f32 %v521_v8, %v513_v5 }
 0x76c   :  { %1706 = vtanh.f32 %v1984_v9 }
 0x76d   :  { %1708 = vtanh.f32 %v1986_v12 }
 0x776   :  { %v1707_v13 = vpop.eup %1706 }
 0x777   :  { %v1709_v15 = vpop.eup %1708  ;;  %456 = vrot.lane.b32.xlu1 %v1707_v13, %s1760_s14 }
 0x778   :  { %526 = vrot.lane.b32.xlu0 %v1709_v15, %s1760_s14 }
 0x7e9   :  { %v457_v16 = vpop.permute.xlu1 %456 }
 0x7ea   :  { %v527_v18 = vpop.permute.xlu0 %526  ;;  %v459_v19 = vmul.f32 %v457_v16, %v442_v59 }
 0x7eb   :  { %v529_v17 = vmul.f32 %v527_v18, %v512_v60 }
 0x7ec   :  { %535 = vrot.lane.b32.xlu0 %v459_v19, %s1760_s14 }
 0x7ed   :  { %531 = vrot.lane.b32.xlu1 %v529_v17, %s1761_s15  ;;  %v605_v21 = vpack.c.bf16 %v529_v17, %v529_v17 }
 0x7f0   :  { %93 = vperm.xlu0 %1681, %v1409_v20  }
 0x7f1   :  { %607 = vrot.lane.b32.xlu1 %v605_v21, %s1761_s15 }
 0x85e   :  { %v536_v22 = vpop.permute.xlu0 %535 }
 0x85f   :  { %v532_v23 = vpop.permute.xlu1 %531 }
 0x860   :  { %v538_v24 = vsel %vm146_vm4, %v532_v23, %v536_v22 }
 0x861   :  { %v539_v25 = vpack.c.bf16 %v538_v24, %v538_v24 }
 0x863   :  { %1564 = vmatmul.mubr.msk.bf16.vlgmr.msra.gmra.mrb[8].mxu1 %vm249_vm5, %v539_v25  ;;  %v608_v26 = vpop.permute.xlu1 %607 }
 0x864   :  { %1572 = vmatmul.mubr.msk.bf16.vlgmr.msra.gmra.mrb[12].mxu0 %vm146_vm4, %v608_v26  ;;  %1588 = vmatpush3.bf16.msra.mxu1 %v1811_v1 }
 0x865   :  { %1576 = vmatpush3.bf16.msra.mxu0 %v1867_v30  ;;  %1589 = vmatprep.subr.bf16.mxu1 %v1756_v0 }
 0x866   :  { %1577 = vmatprep.subr.bf16.mxu0 %v1756_v0  ;;  %1583 = vmatprep.mubr.msk.bf16.mxu0 %vm1757_vm0, %v1756_v0 }
 0x867   :  { %1591 = vmatprep.mubr.msk.bf16.mxu1 %vm1757_vm0, %v1756_v0 }
 0x868   :  { %1590 = vmatpush3.bf16.msra.mxu1 %v1820_v3 }
 0x869   :  { %1578 = vmatpush3.bf16.msra.mxu0 %v1873_v31  ;;  %1595 = vmatprep.subr.bf16.mxu1 %v1756_v0 }
 0x86a   :  { %1579 = vmatprep.subr.bf16.mxu0 %v1756_v0 }
 0x86d   :  { %1580 = vmatpush3.bf16.msra.mxu0 %v1881_v33 }
 0x86e   :  { %1581 = vmatprep.subr.bf16.mxu0 %v1756_v0 }
 0x86f   :  { %v94_v27 = vpop.permute.xlu0 %93 }
 0x870   :  { %v96_v28 = vmul.f32 %v1839_v6, %v94_v27 }
 0x871   :  { %1582 = vmatpush3.bf16.msra.mxu0 %v1889_v34 }
 0x872   :  { %1607 = vmatprep.subr.bf16.mxu0 %v1756_v0  ;;  %v97_v32 = vadd.f32 %v1845_v10, %v96_v28 }
 0x936   :  { %v577_v29 = vpop.f32.mrb[8].mxu1 }
 0x937   :  { %v578_v35 = vadd.f32 %v1922_v46, %v577_v29  ;;  %v1565_v36 = vpop.f32.mrb[9].mxu1  ;;  %v646_v37 = vpop.f32.mrb[12].mxu0 }
 0x938   :  { %v652_v38 = vadd.f32 %v646_v37, %v97_v32  ;;  %v580_v39 = vpop.f32.mrb[10].mxu1  ;;  %v1573_v40 = vpop.f32.mrb[13].mxu0 }
 0x939   :  { %v583_v41 = vmul.f32 %v578_v35, %v1854_v14  ;;  %v1566_v42 = vpop.f32.mrb[11].mxu1  ;;  %v649_v43 = vpop.f32.mrb[14].mxu0 }
 0x93a   :  { %v653_v44 = vmul.f32 %v652_v38, %v1854_v14  ;;  %v1574_v45 = vpop.f32.mrb[15].mxu0 }
 0x93b   :  { %1710 = vtanh.f32 %v583_v41 }
 0x93c   :  { %1712 = vtanh.f32 %v653_v44 }
 0x945   :  { %v1711_v47 = vpop.eup %1710 }
 0x946   :  { %v1713_v48 = vpop.eup %1712  ;;  %v585_v49 = vmul.f32 0.5, %v1711_v47 }
 0x947   :  { %v655_v50 = vmul.f32 0.5, %v1713_v48 }
 0x948   :  { %v586_v51 = vadd.f32 0.5, %v585_v49 }
 0x949   :  { %v656_v52 = vadd.f32 0.5, %v655_v50 }
 0x94a   :  { %v587_v53 = vsel %vm1847_vm3, %v1711_v47, %v586_v51 }
 0x94b   :  { %590 = vrot.lane.b32.xlu1 %v587_v53, %s1760_s14  ;;  %v657_v54 = vsel %vm1847_vm3, %v1713_v48, %v656_v52  ;;  %v588_v59 = vmul.f32 %v587_v53, %v1984_v9 }
 0x94c   :  { %660 = vrot.lane.b32.xlu0 %v657_v54, %s1760_s14  ;;  %v658_v61 = vmul.f32 %v657_v54, %v1986_v12  ;;  %v1410_v12 = vld [vmem:[%s2252_s0 + $0x20] sm:$0xff] }
 0x9bd   :  { %v591_v55 = vpop.permute.xlu1 %590 }
 0x9be   :  { %v593_v56 = vmul.f32 %v591_v55, %v587_v53  ;;  %v661_v57 = vpop.permute.xlu0 %660 }
 0x9bf   :  { %v663_v58 = vmul.f32 %v661_v57, %v657_v54 }
 0x9c0   :  { %595 = vrot.lane.b32.xlu1 %v593_v56, %s1761_s15 }
 0x9c1   :  { %665 = vrot.lane.b32.xlu0 %v663_v58, %s1761_s15 }
 0xa32   :  { %v596_v60 = vpop.permute.xlu1 %595 }
 0xa33   :  { %v2032_v62 = vadd.f32 %v596_v60, %v588_v59  ;;  %v666_v63 = vpop.permute.xlu0 %665 }
 0xa34   :  { %v2034_v2 = vadd.f32 %v666_v63, %v658_v61 }
 0xa35   :  { %1714 = vtanh.f32 %v2032_v62 }
 0xa36   :  { %1716 = vtanh.f32 %v2034_v2 }
 0xa3f   :  { %v1715_v4 = vpop.eup %1714 }
 0xa40   :  { %v1717_v5 = vpop.eup %1716  ;;  %601 = vrot.lane.b32.xlu1 %v1715_v4, %s1760_s14 }
 0xa41   :  { %671 = vrot.lane.b32.xlu0 %v1717_v5, %s1760_s14 }
 0xab2   :  { %v602_v7 = vpop.permute.xlu1 %601 }
 0xab3   :  { %v604_v8 = vmul.f32 %v602_v7, %v587_v53  ;;  %v672_v9 = vpop.permute.xlu0 %671 }
 0xab4   :  { %v674_v13 = vmul.f32 %v672_v9, %v657_v54 }
 0xab5   :  { %680 = vrot.lane.b32.xlu0 %v604_v8, %s1760_s14 }
 0xab6   :  { %676 = vrot.lane.b32.xlu1 %v674_v13, %s1761_s15  ;;  %v750_v15 = vpack.c.bf16 %v674_v13, %v674_v13 }
 0xab9   :  { %102 = vperm.xlu0 %1681, %v1410_v12  }
 0xaba   :  { %752 = vrot.lane.b32.xlu1 %v750_v15, %s1761_s15 }
 0xb27   :  { %v681_v16 = vpop.permute.xlu0 %680 }
 0xb28   :  { %v677_v18 = vpop.permute.xlu1 %676 }
 0xb29   :  { %v683_v19 = vsel %vm146_vm4, %v677_v18, %v681_v16 }
 0xb2a   :  { %v684_v17 = vpack.c.bf16 %v683_v19, %v683_v19 }
 0xb2c   :  { %1584 = vmatmul.mubr.msk.bf16.vlgmr.msra.gmra.mrb[16].mxu0 %vm249_vm5, %v684_v17  ;;  %v753_v20 = vpop.permute.xlu1 %752 }
 0xb2d   :  { %1592 = vmatmul.mubr.msk.bf16.vlgmr.msra.gmra.mrb[12].mxu1 %vm146_vm4, %v753_v20  ;;  %1608 = vmatpush3.bf16.msra.mxu0 %v1811_v1 }
 0xb2e   :  { %1596 = vmatpush3.bf16.msra.mxu1 %v1867_v30  ;;  %1609 = vmatprep.subr.bf16.mxu0 %v1756_v0 }
 0xb2f   :  { %1597 = vmatprep.subr.bf16.mxu1 %v1756_v0  ;;  %1603 = vmatprep.mubr.msk.bf16.mxu1 %vm1757_vm0, %v1756_v0 }
 0xb30   :  { %1611 = vmatprep.mubr.msk.bf16.mxu0 %vm1757_vm0, %v1756_v0 }
 0xb31   :  { %1610 = vmatpush3.bf16.msra.mxu0 %v1820_v3 }
 0xb32   :  { %1598 = vmatpush3.bf16.msra.mxu1 %v1873_v31  ;;  %1615 = vmatprep.subr.bf16.mxu0 %v1756_v0 }
 0xb33   :  { %1599 = vmatprep.subr.bf16.mxu1 %v1756_v0 }
 0xb36   :  { %1600 = vmatpush3.bf16.msra.mxu1 %v1881_v33 }
 0xb37   :  { %1601 = vmatprep.subr.bf16.mxu1 %v1756_v0 }
 0xb38   :  { %v103_v21 = vpop.permute.xlu0 %102 }
 0xb39   :  { %v105_v22 = vmul.f32 %v1839_v6, %v103_v21 }
 0xb3a   :  { %1602 = vmatpush3.bf16.msra.mxu1 %v1889_v34 }
 0xb3b   :  { %1627 = vmatprep.subr.bf16.mxu1 %v1756_v0  ;;  %v106_v24 = vadd.f32 %v1845_v10, %v105_v22 }
 0xbff   :  { %v722_v23 = vpop.f32.mrb[16].mxu0 }
 0xc00   :  { %v723_v25 = vadd.f32 %v1922_v46, %v722_v23  ;;  %v1585_v26 = vpop.f32.mrb[17].mxu0  ;;  %v791_v27 = vpop.f32.mrb[12].mxu1 }
 0xc01   :  { %v797_v28 = vadd.f32 %v791_v27, %v106_v24  ;;  %v725_v29 = vpop.f32.mrb[18].mxu0  ;;  %v1593_v32 = vpop.f32.mrb[13].mxu1 }
 0xc02   :  { %v728_v35 = vmul.f32 %v723_v25, %v1854_v14  ;;  %v1586_v36 = vpop.f32.mrb[19].mxu0  ;;  %v794_v37 = vpop.f32.mrb[14].mxu1 }
 0xc03   :  { %v798_v38 = vmul.f32 %v797_v28, %v1854_v14  ;;  %v1594_v39 = vpop.f32.mrb[15].mxu1 }
 0xc04   :  { %1718 = vtanh.f32 %v728_v35 }
 0xc05   :  { %1720 = vtanh.f32 %v798_v38 }
 0xc0e   :  { %v1719_v40 = vpop.eup %1718 }
 0xc0f   :  { %v1721_v41 = vpop.eup %1720  ;;  %v730_v42 = vmul.f32 0.5, %v1719_v40 }
 0xc10   :  { %v800_v43 = vmul.f32 0.5, %v1721_v41 }
 0xc11   :  { %v731_v44 = vadd.f32 0.5, %v730_v42 }
 0xc12   :  { %v801_v45 = vadd.f32 0.5, %v800_v43 }
 0xc13   :  { %v732_v47 = vsel %vm1847_vm3, %v1719_v40, %v731_v44 }
 0xc14   :  { %735 = vrot.lane.b32.xlu1 %v732_v47, %s1760_s14  ;;  %v802_v48 = vsel %vm1847_vm3, %v1721_v41, %v801_v45  ;;  %v733_v53 = vmul.f32 %v732_v47, %v2032_v62 }
 0xc15   :  { %805 = vrot.lane.b32.xlu0 %v802_v48, %s1760_s14  ;;  %v803_v55 = vmul.f32 %v802_v48, %v2034_v2  ;;  %v1411_v2 = vld [vmem:[%s2252_s0 + $0x28] sm:$0xff] }
 0xc86   :  { %v736_v49 = vpop.permute.xlu1 %735 }
 0xc87   :  { %v738_v50 = vmul.f32 %v736_v49, %v732_v47  ;;  %v806_v51 = vpop.permute.xlu0 %805 }
 0xc88   :  { %v808_v52 = vmul.f32 %v806_v51, %v802_v48 }
 0xc89   :  { %740 = vrot.lane.b32.xlu1 %v738_v50, %s1761_s15 }
 0xc8a   :  { %810 = vrot.lane.b32.xlu0 %v808_v52, %s1761_s15 }
 0xcfb   :  { %v741_v54 = vpop.permute.xlu1 %740 }
 0xcfc   :  { %v2080_v56 = vadd.f32 %v741_v54, %v733_v53  ;;  %v811_v57 = vpop.permute.xlu0 %810 }
 0xcfd   :  { %v2082_v58 = vadd.f32 %v811_v57, %v803_v55 }
 0xcfe   :  { %1722 = vtanh.f32 %v2080_v56 }
 0xcff   :  { %1724 = vtanh.f32 %v2082_v58 }
 0xd08   :  { %v1723_v59 = vpop.eup %1722 }
 0xd09   :  { %v1725_v60 = vpop.eup %1724  ;;  %746 = vrot.lane.b32.xlu1 %v1723_v59, %s1760_s14 }
 0xd0a   :  { %816 = vrot.lane.b32.xlu0 %v1725_v60, %s1760_s14 }
 0xd7b   :  { %v747_v61 = vpop.permute.xlu1 %746 }
 0xd7c   :  { %v749_v62 = vmul.f32 %v747_v61, %v732_v47  ;;  %v817_v63 = vpop.permute.xlu0 %816 }
 0xd7d   :  { %v819_v4 = vmul.f32 %v817_v63, %v802_v48 }
 0xd7e   :  { %825 = vrot.lane.b32.xlu0 %v749_v62, %s1760_s14 }
 0xd7f   :  { %821 = vrot.lane.b32.xlu1 %v819_v4, %s1761_s15  ;;  %v895_v5 = vpack.c.bf16 %v819_v4, %v819_v4 }
 0xd82   :  { %111 = vperm.xlu0 %1681, %v1411_v2  }
 0xd83   :  { %897 = vrot.lane.b32.xlu1 %v895_v5, %s1761_s15 }
 0xdf0   :  { %v826_v7 = vpop.permute.xlu0 %825 }
 0xdf1   :  { %v822_v8 = vpop.permute.xlu1 %821 }
 0xdf2   :  { %v828_v9 = vsel %vm146_vm4, %v822_v8, %v826_v7 }
 0xdf3   :  { %v829_v13 = vpack.c.bf16 %v828_v9, %v828_v9 }
 0xdf5   :  { %1604 = vmatmul.mubr.msk.bf16.vlgmr.msra.gmra.mrb[16].mxu1 %vm249_vm5, %v829_v13  ;;  %v898_v12 = vpop.permute.xlu1 %897 }
 0xdf6   :  { %1612 = vmatmul.mubr.msk.bf16.vlgmr.msra.gmra.mrb[20].mxu0 %vm146_vm4, %v898_v12  ;;  %1628 = vmatpush3.bf16.msra.mxu1 %v1811_v1 }
 0xdf7   :  { %1616 = vmatpush3.bf16.msra.mxu0 %v1867_v30  ;;  %1629 = vmatprep.subr.bf16.mxu1 %v1756_v0 }
 0xdf8   :  { %1617 = vmatprep.subr.bf16.mxu0 %v1756_v0  ;;  %1623 = vmatprep.mubr.msk.bf16.mxu0 %vm1757_vm0, %v1756_v0 }
 0xdf9   :  { %1631 = vmatprep.mubr.msk.bf16.mxu1 %vm1757_vm0, %v1756_v0 }
 0xdfa   :  { %1630 = vmatpush3.bf16.msra.mxu1 %v1820_v3 }
 0xdfb   :  { %1618 = vmatpush3.bf16.msra.mxu0 %v1873_v31  ;;  %1635 = vmatprep.subr.bf16.mxu1 %v1756_v0 }
 0xdfc   :  { %1619 = vmatprep.subr.bf16.mxu0 %v1756_v0 }
 0xdff   :  { %1620 = vmatpush3.bf16.msra.mxu0 %v1881_v33 }
 0xe00   :  { %1621 = vmatprep.subr.bf16.mxu0 %v1756_v0 }
 0xe01   :  { %v112_v15 = vpop.permute.xlu0 %111 }
 0xe02   :  { %v114_v16 = vmul.f32 %v1839_v6, %v112_v15 }
 0xe03   :  { %1622 = vmatpush3.bf16.msra.mxu0 %v1889_v34 }
 0xe04   :  { %1647 = vmatprep.subr.bf16.mxu0 %v1756_v0  ;;  %v115_v19 = vadd.f32 %v1845_v10, %v114_v16 }
 0xec8   :  { %v867_v18 = vpop.f32.mrb[16].mxu1 }
 0xec9   :  { %v868_v17 = vadd.f32 %v1922_v46, %v867_v18  ;;  %v1605_v20 = vpop.f32.mrb[17].mxu1  ;;  %v936_v21 = vpop.f32.mrb[20].mxu0 }
 0xeca   :  { %v942_v22 = vadd.f32 %v936_v21, %v115_v19  ;;  %v870_v23 = vpop.f32.mrb[18].mxu1  ;;  %v1613_v24 = vpop.f32.mrb[21].mxu0 }
 0xecb   :  { %v873_v25 = vmul.f32 %v868_v17, %v1854_v14  ;;  %v1606_v26 = vpop.f32.mrb[19].mxu1  ;;  %v939_v27 = vpop.f32.mrb[22].mxu0 }
 0xecc   :  { %v943_v28 = vmul.f32 %v942_v22, %v1854_v14  ;;  %v1614_v29 = vpop.f32.mrb[23].mxu0 }
 0xecd   :  { %1726 = vtanh.f32 %v873_v25 }
 0xece   :  { %1728 = vtanh.f32 %v943_v28 }
 0xed7   :  { %v1727_v32 = vpop.eup %1726 }
 0xed8   :  { %v1729_v35 = vpop.eup %1728  ;;  %v875_v36 = vmul.f32 0.5, %v1727_v32 }
 0xed9   :  { %v945_v37 = vmul.f32 0.5, %v1729_v35 }
 0xeda   :  { %v876_v38 = vadd.f32 0.5, %v875_v36 }
 0xedb   :  { %v946_v39 = vadd.f32 0.5, %v945_v37 }
 0xedc   :  { %v877_v40 = vsel %vm1847_vm3, %v1727_v32, %v876_v38 }
 0xedd   :  { %880 = vrot.lane.b32.xlu1 %v877_v40, %s1760_s14  ;;  %v947_v41 = vsel %vm1847_vm3, %v1729_v35, %v946_v39  ;;  %v878_v47 = vmul.f32 %v877_v40, %v2080_v56 }
 0xede   :  { %950 = vrot.lane.b32.xlu0 %v947_v41, %s1760_s14  ;;  %v948_v49 = vmul.f32 %v947_v41, %v2082_v58  ;;  %v1412_v58 = vld [vmem:[%s2252_s0 + $0x30] sm:$0xff] }
 0xf4f   :  { %v881_v42 = vpop.permute.xlu1 %880 }
 0xf50   :  { %v883_v43 = vmul.f32 %v881_v42, %v877_v40  ;;  %v951_v44 = vpop.permute.xlu0 %950 }
 0xf51   :  { %v953_v45 = vmul.f32 %v951_v44, %v947_v41 }
 0xf52   :  { %885 = vrot.lane.b32.xlu1 %v883_v43, %s1761_s15 }
 0xf53   :  { %955 = vrot.lane.b32.xlu0 %v953_v45, %s1761_s15 }
 0xfc4   :  { %v886_v48 = vpop.permute.xlu1 %885 }
 0xfc5   :  { %v2128_v50 = vadd.f32 %v886_v48, %v878_v47  ;;  %v956_v51 = vpop.permute.xlu0 %955 }
 0xfc6   :  { %v2130_v52 = vadd.f32 %v956_v51, %v948_v49  ;;  %v1413_v49 = vld [vmem:[%s2252_s0 + $0x38] sm:$0xff] }
 0xfc7   :  { %1730 = vtanh.f32 %v2128_v50 }
 0xfc8   :  { %1732 = vtanh.f32 %v2130_v52 }
 0xfd1   :  { %v1731_v53 = vpop.eup %1730 }
 0xfd2   :  { %v1733_v54 = vpop.eup %1732  ;;  %891 = vrot.lane.b32.xlu1 %v1731_v53, %s1760_s14 }
 0xfd3   :  { %961 = vrot.lane.b32.xlu0 %v1733_v54, %s1760_s14 }
0x1044   :  { %v892_v55 = vpop.permute.xlu1 %891 }
0x1045   :  { %v894_v56 = vmul.f32 %v892_v55, %v877_v40  ;;  %v962_v57 = vpop.permute.xlu0 %961 }
0x1046   :  { %v964_v59 = vmul.f32 %v962_v57, %v947_v41 }
0x1047   :  { %970 = vrot.lane.b32.xlu0 %v894_v56, %s1760_s14 }
0x1048   :  { %966 = vrot.lane.b32.xlu1 %v964_v59, %s1761_s15  ;;  %v1040_v60 = vpack.c.bf16 %v964_v59, %v964_v59 }
0x104b   :  { %120 = vperm.xlu0 %1681, %v1412_v58   ;;  %v1755_v58 = vld [vmem:[%s2254_s3] ss:$0 sm:$0xff] }
0x104c   :  { %1042 = vrot.lane.b32.xlu1 %v1040_v60, %s1761_s15 }
0x10b9   :  { %v971_v61 = vpop.permute.xlu0 %970 }
0x10ba   :  { %v967_v62 = vpop.permute.xlu1 %966 }
0x10bb   :  { %v973_v63 = vsel %vm146_vm4, %v967_v62, %v971_v61 }
0x10bc   :  { %v974_v4 = vpack.c.bf16 %v973_v63, %v973_v63 }
0x10be   :  { %1624 = vmatmul.mubr.msk.bf16.vlgmr.msra.gmra.mrb[24].mxu0 %vm249_vm5, %v974_v4  ;;  %v1043_v2 = vpop.permute.xlu1 %1042 }
0x10bf   :  { %1632 = vmatmul.mubr.msk.bf16.vlgmr.msra.gmra.mrb[20].mxu1 %vm146_vm4, %v1043_v2  ;;  %1648 = vmatpush3.bf16.msra.mxu0 %v1811_v1 }
0x10c0   :  { %1636 = vmatpush3.bf16.msra.mxu1 %v1867_v30  ;;  %1649 = vmatprep.subr.bf16.mxu0 %v1756_v0 }
0x10c1   :  { %1637 = vmatprep.subr.bf16.mxu1 %v1756_v0  ;;  %1643 = vmatprep.mubr.msk.bf16.mxu1 %vm1757_vm0, %v1756_v0 }
0x10c2   :  { %1651 = vmatprep.mubr.msk.bf16.mxu0 %vm1757_vm0, %v1756_v0 }
0x10c3   :  { %1650 = vmatpush3.bf16.msra.mxu0 %v1820_v3 }
0x10c4   :  { %1638 = vmatpush3.bf16.msra.mxu1 %v1873_v31  ;;  %1655 = vmatprep.subr.bf16.mxu0 %v1756_v0 }
0x10c5   :  { %1639 = vmatprep.subr.bf16.mxu1 %v1756_v0 }
0x10c8   :  { %1640 = vmatpush3.bf16.msra.mxu1 %v1881_v33 }
0x10c9   :  { %1641 = vmatprep.subr.bf16.mxu1 %v1756_v0 }
0x10ca   :  { %v121_v1 = vpop.permute.xlu0 %120 }
0x10cb   :  { %v123_v5 = vmul.f32 %v1839_v6, %v121_v1 }
0x10cc   :  { %1642 = vmatpush3.bf16.msra.mxu1 %v1889_v34 }
0x10cd   :  { %1667 = vmatprep.subr.bf16.mxu1 %v1756_v0  ;;  %v124_v3 = vadd.f32 %v1845_v10, %v123_v5 }
0x1191   :  { %v1012_v7 = vpop.f32.mrb[24].mxu0 }
0x1192   :  { %v1013_v8 = vadd.f32 %v1922_v46, %v1012_v7  ;;  %v1625_v9 = vpop.f32.mrb[25].mxu0  ;;  %v1081_v13 = vpop.f32.mrb[20].mxu1 }
0x1193   :  { %v1087_v12 = vadd.f32 %v1081_v13, %v124_v3  ;;  %v1015_v15 = vpop.f32.mrb[26].mxu0  ;;  %v1633_v16 = vpop.f32.mrb[21].mxu1 }
0x1194   :  { %v1018_v18 = vmul.f32 %v1013_v8, %v1854_v14  ;;  %v1626_v19 = vpop.f32.mrb[27].mxu0  ;;  %v1084_v17 = vpop.f32.mrb[22].mxu1 }
0x1195   :  { %v1088_v20 = vmul.f32 %v1087_v12, %v1854_v14  ;;  %v1634_v21 = vpop.f32.mrb[23].mxu1 }
0x1196   :  { %1734 = vtanh.f32 %v1018_v18 }
0x1197   :  { %1736 = vtanh.f32 %v1088_v20 }
0x11a0   :  { %v1735_v6 = vpop.eup %1734 }
0x11a1   :  { %v1737_v22 = vpop.eup %1736  ;;  %v1020_v23 = vmul.f32 0.5, %v1735_v6 }
0x11a2   :  { %v1090_v10 = vmul.f32 0.5, %v1737_v22 }
0x11a3   :  { %v1021_v24 = vadd.f32 0.5, %v1020_v23 }
0x11a4   :  { %v1091_v25 = vadd.f32 0.5, %v1090_v10 }
0x11a5   :  { %v1022_v26 = vsel %vm1847_vm3, %v1735_v6, %v1021_v24 }
0x11a6   :  { %1025 = vrot.lane.b32.xlu1 %v1022_v26, %s1760_s14  ;;  %v1092_v27 = vsel %vm1847_vm3, %v1737_v22, %v1091_v25  ;;  %v1023_v36 = vmul.f32 %v1022_v26, %v2128_v50 }
0x11a7   :  { %1095 = vrot.lane.b32.xlu0 %v1092_v27, %s1760_s14  ;;  %v1093_v38 = vmul.f32 %v1092_v27, %v2130_v52 }
0x1218   :  { %v1026_v28 = vpop.permute.xlu1 %1025 }
0x1219   :  { %v1028_v29 = vmul.f32 %v1026_v28, %v1022_v26  ;;  %v1096_v32 = vpop.permute.xlu0 %1095 }
0x121a   :  { %v1098_v35 = vmul.f32 %v1096_v32, %v1092_v27 }
0x121b   :  { %1030 = vrot.lane.b32.xlu1 %v1028_v29, %s1761_s15 }
0x121c   :  { %1100 = vrot.lane.b32.xlu0 %v1098_v35, %s1761_s15 }
0x128d   :  { %v1031_v37 = vpop.permute.xlu1 %1030 }
0x128e   :  { %v2176_v39 = vadd.f32 %v1031_v37, %v1023_v36  ;;  %v1101_v40 = vpop.permute.xlu0 %1100 }
0x128f   :  { %v2178_v41 = vadd.f32 %v1101_v40, %v1093_v38 }
0x1290   :  { %1738 = vtanh.f32 %v2176_v39 }
0x1291   :  { %1740 = vtanh.f32 %v2178_v41 }
0x129a   :  { %v1739_v42 = vpop.eup %1738 }
0x129b   :  { %v1741_v43 = vpop.eup %1740  ;;  %1036 = vrot.lane.b32.xlu1 %v1739_v42, %s1760_s14 }
0x129c   :  { %1106 = vrot.lane.b32.xlu0 %v1741_v43, %s1760_s14 }
0x130d   :  { %v1037_v44 = vpop.permute.xlu1 %1036 }
0x130e   :  { %v1039_v45 = vmul.f32 %v1037_v44, %v1022_v26  ;;  %v1107_v47 = vpop.permute.xlu0 %1106 }
0x130f   :  { %v1109_v48 = vmul.f32 %v1107_v47, %v1092_v27 }
0x1310   :  { %1115 = vrot.lane.b32.xlu0 %v1039_v45, %s1760_s14 }
0x1311   :  { %1111 = vrot.lane.b32.xlu1 %v1109_v48, %s1761_s15  ;;  %v1185_v50 = vpack.c.bf16 %v1109_v48, %v1109_v48 }
0x1314   :  { %129 = vperm.xlu0 %1681, %v1413_v49  }
0x1315   :  { %1187 = vrot.lane.b32.xlu1 %v1185_v50, %s1761_s15 }
0x1382   :  { %v1116_v51 = vpop.permute.xlu0 %1115 }
0x1383   :  { %v1112_v52 = vpop.permute.xlu1 %1111 }
0x1384   :  { %v1118_v53 = vsel %vm146_vm4, %v1112_v52, %v1116_v51 }
0x1385   :  { %v1119_v54 = vpack.c.bf16 %v1118_v53, %v1118_v53 }
0x1387   :  { %1644 = vmatmul.mubr.msk.bf16.vlgmr.msra.gmra.mrb[24].mxu1 %vm249_vm5, %v1119_v54  ;;  %v1188_v55 = vpop.permute.xlu1 %1187 }
0x1388   :  { %1652 = vmatmul.mubr.msk.bf16.vlgmr.msra.gmra.mrb[28].mxu0 %vm146_vm4, %v1188_v55  ;;  %1671 = vmatprep.mubr.msk.bf16.mxu1 %vm1757_vm0, %v1756_v0 }
0x1389   :  { %1656 = vmatpush3.bf16.msra.mxu0 %v1867_v30  ;;  %1663 = vmatprep.mubr.msk.bf16.mxu0 %vm1757_vm0, %v1756_v0  ;;  %v1754_v30 = vld [vmem:[%s2253_s1] ss:$0 sm:$0xff] }
0x138a   :  { %1657 = vmatprep.subr.bf16.mxu0 %v1756_v0 }
0x138d   :  { %1658 = vmatpush3.bf16.msra.mxu0 %v1873_v31 }
0x138e   :  { %1659 = vmatprep.subr.bf16.mxu0 %v1756_v0 }
0x1391   :  { %1660 = vmatpush3.bf16.msra.mxu0 %v1881_v33 }
0x1392   :  { %1661 = vmatprep.subr.bf16.mxu0 %v1756_v0 }
0x1393   :  { %v130_v56 = vpop.permute.xlu0 %129 }
0x1394   :  { %v132_v57 = vmul.f32 %v1754_v30, %v130_v56 }
0x1395   :  { %1662 = vmatpush3.bf16.msra.mxu0 %v1889_v34 }
0x1396   :  { %v133_v31 = vadd.f32 %v1755_v58, %v132_v57  ;;  %v1436_v58 = vld [vmem:[%s2258_s7] ss:$0 sm:$0xff] }
0x145a   :  { %v1157_v59 = vpop.f32.mrb[24].mxu1 }
0x145b   :  { %v1158_v60 = vadd.f32 %v1922_v46, %v1157_v59  ;;  %v1645_v61 = vpop.f32.mrb[25].mxu1  ;;  %v1226_v33 = vpop.f32.mrb[28].mxu0 }
0x145c   :  { %v1232_v62 = vadd.f32 %v1226_v33, %v133_v31  ;;  %v1160_v63 = vpop.f32.mrb[26].mxu1  ;;  %v1653_v4 = vpop.f32.mrb[29].mxu0 }
0x145d   :  { %v1163_v34 = vmul.f32 %v1158_v60, %v1854_v14  ;;  %v1646_v2 = vpop.f32.mrb[27].mxu1  ;;  %v1229_v1 = vpop.f32.mrb[30].mxu0 }
0x145e   :  { %v1233_v5 = vmul.f32 %v1232_v62, %v1854_v14  ;;  %v1654_v7 = vpop.f32.mrb[31].mxu0 }
0x145f   :  { %1742 = vtanh.f32 %v1163_v34 }
0x1460   :  { %1744 = vtanh.f32 %v1233_v5 }
0x1469   :  { %v1743_v3 = vpop.eup %1742 }
0x146a   :  { %v1745_v8 = vpop.eup %1744  ;;  %v1165_v9 = vmul.f32 0.5, %v1743_v3 }
0x146b   :  { %v1235_v13 = vmul.f32 0.5, %v1745_v8 }
0x146c   :  { %v1166_v12 = vadd.f32 0.5, %v1165_v9 }
0x146d   :  { %v1236_v15 = vadd.f32 0.5, %v1235_v13 }
0x146e   :  { %v1167_v16 = vsel %vm1847_vm3, %v1743_v3, %v1166_v12 }
0x146f   :  { %1170 = vrot.lane.b32.xlu1 %v1167_v16, %s1760_s14  ;;  %v1237_v18 = vsel %vm1847_vm3, %v1745_v8, %v1236_v15  ;;  %v1168_v6 = vmul.f32 %v1167_v16, %v2176_v39 }
0x1470   :  { %1240 = vrot.lane.b32.xlu0 %v1237_v18, %s1760_s14  ;;  %v1238_v23 = vmul.f32 %v1237_v18, %v2178_v41 }
0x14e1   :  { %v1171_v19 = vpop.permute.xlu1 %1170 }
0x14e2   :  { %v1173_v17 = vmul.f32 %v1171_v19, %v1167_v16  ;;  %v1241_v20 = vpop.permute.xlu0 %1240 }
0x14e3   :  { %v1243_v21 = vmul.f32 %v1241_v20, %v1237_v18 }
0x14e4   :  { %1175 = vrot.lane.b32.xlu1 %v1173_v17, %s1761_s15 }
0x14e5   :  { %1245 = vrot.lane.b32.xlu0 %v1243_v21, %s1761_s15 }
0x1556   :  { %v1176_v22 = vpop.permute.xlu1 %1175 }
0x1557   :  { %v1178_v10 = vadd.f32 %v1176_v22, %v1168_v6  ;;  %v1246_v24 = vpop.permute.xlu0 %1245 }
0x1558   :  { %v1248_v25 = vadd.f32 %v1246_v24, %v1238_v23 }
0x1559   :  { %1746 = vtanh.f32 %v1178_v10 }
0x155a   :  { %1748 = vtanh.f32 %v1248_v25 }
0x1563   :  { %v1747_v26 = vpop.eup %1746 }
0x1564   :  { %v1749_v27 = vpop.eup %1748  ;;  %1181 = vrot.lane.b32.xlu1 %v1747_v26, %s1760_s14 }
0x1565   :  { %1251 = vrot.lane.b32.xlu0 %v1749_v27, %s1760_s14 }
0x15d6   :  { %v1182_v28 = vpop.permute.xlu1 %1181 }
0x15d7   :  { %v1184_v29 = vmul.f32 %v1182_v28, %v1167_v16  ;;  %v1252_v32 = vpop.permute.xlu0 %1251 }
0x15d8   :  { %v1254_v35 = vmul.f32 %v1252_v32, %v1237_v18 }
0x15d9   :  { %1260 = vrot.lane.b32.xlu0 %v1184_v29, %s1760_s14 }
0x15da   :  { %1256 = vrot.lane.b32.xlu1 %v1254_v35, %s1761_s15 }
0x164b   :  { %v1261_v36 = vpop.permute.xlu0 %1260 }
0x164c   :  { %v1257_v37 = vpop.permute.xlu1 %1256 }
0x164d   :  { %v1263_v38 = vsel %vm146_vm4, %v1257_v37, %v1261_v36 }
0x164e   :  { %v1264_v39 = vpack.c.bf16 %v1263_v38, %v1263_v38 }
0x1650   :  { %1664 = vmatmul.mubr.msk.bf16.vlgmr.msra.gmra.mrb[32].mxu0 %vm249_vm5, %v1264_v39 }
0x1723   :  { %v1302_v40 = vpop.f32.mrb[32].mxu0 }
0x1724   :  { %v1303_v41 = vadd.f32 %v1922_v46, %v1302_v40  ;;  %v1665_v42 = vpop.f32.mrb[33].mxu0 }
0x1725   :  { %v1305_v43 = vpop.f32.mrb[34].mxu0 }
0x1726   :  { %v1308_v44 = vmul.f32 %v1303_v41, %v1854_v14  ;;  %v1666_v45 = vpop.f32.mrb[35].mxu0  ;;  %v1688_v14 = vld [vmem:[%s2257_s6] sm:$0xff]  }
0x1727   :  { %1668 = vmatpush3.bf16.msra.mxu1 %v1688_v14 }
0x1728   :  { %1750 = vtanh.f32 %v1308_v44  ;;  %1669 = vmatprep.subr.bf16.mxu1 %v1756_v0 }
0x172b   :  { %1670 = vmatpush3.bf16.msra.mxu1 %v1689_v11 }
0x1732   :  { %v1751_v47 = vpop.eup %1750 }
0x1733   :  { %v1310_v48 = vmul.f32 0.5, %v1751_v47 }
0x1735   :  { %v1311_v49 = vadd.f32 0.5, %v1310_v48 }
0x1737   :  { %v1312_v50 = vsel %vm1847_vm3, %v1751_v47, %v1311_v49 }
0x1738   :  { %1315 = vrot.lane.b32.xlu1 %v1312_v50, %s1760_s14  ;;  %v1313_v53 = vmul.f32 %v1312_v50, %v1178_v10 }
0x17aa   :  { %v1316_v51 = vpop.permute.xlu1 %1315 }
0x17ab   :  { %v1318_v52 = vmul.f32 %v1316_v51, %v1312_v50 }
0x17ad   :  { %1320 = vrot.lane.b32.xlu0 %v1318_v52, %s1761_s15 }
0x181f   :  { %v1321_v46 = vpop.permute.xlu0 %1320 }
0x1820   :  { %v1323_v54 = vadd.f32 %v1321_v46, %v1313_v53 }
0x1822   :  { %1752 = vtanh.f32 %v1323_v54 }
0x182c   :  { %v1753_v55 = vpop.eup %1752 }
0x182d   :  { %1326 = vrot.lane.b32.xlu1 %v1753_v55, %s1760_s14 }
0x189f   :  { %v1327_v56 = vpop.permute.xlu1 %1326 }
0x18a0   :  { %v1329_v30 = vmul.f32 %v1327_v56, %v1312_v50 }
0x18a2   :  { %v1330_v57 = vpack.c.bf16 %v1329_v30, %v1329_v30 }
0x18a4   :  { %1343 = vrot.lane.b32.xlu0 %v1330_v57, %s1761_s15 }
0x1916   :  { %v1344_v59 = vpop.permute.xlu0 %1343 }
0x1917   :  { %1672 = vmatmul.mubr.msk.bf16.vlgmr.msra.gmra.mrb[28].mxu1 %vm146_vm4, %v1344_v59 }
0x19ea   :  { %v1394_v31 = vpop.f32.mrb[28].mxu1 }
0x19eb   :  { %v1395_v60 = vadd.f32 %v1436_v58, %v1394_v31  ;;  %v1673_v61 = vpop.f32.mrb[29].mxu1 }
0x19ec   :  { %v1397_v0 = vpop.f32.mrb[30].mxu1 }
0x19ed   :  { %1400 = vst [vmem:[%s2259_s8] sm:$0xff] %v1395_v60  ;;  %v1674_v33 = vpop.f32.mrb[31].mxu1 }

</bundles_post_ra>
